<compile_context>
chip_gen: v7x
topology: tpu7x:2x2x1
jax: 0.10.0
libtpu: 0.0.40
codegen_flags: <defaults>
</compile_context>

<pallas_src>
import numpy as np
import jax
import jax.numpy as jnp
from jax.experimental import pallas as pl
from jax.experimental.pallas import tpu as pltpu

LANE = 128
ROW_CHUNK = 8          # output rows accumulated per in-register/value chunk


def _round_up(x, m):
    return (x + m - 1) // m * m


def _pad_channels(x, k):
    c = x.shape[-1]
    if c == k:
        return x
    return jnp.pad(x, [(0, 0)] * (x.ndim - 1) + [(0, k - c)])


def _border_mask(hp, wp, h, w):
    """(hp*wp, 1) f32 mask: 1.0 on the valid h x w region at offset (1, 1)."""
    m = np.zeros((hp, wp), np.float32)
    m[1:1 + h, 1:1 + w] = 1.0
    return jnp.asarray(m.reshape(hp * wp, 1))


# ------------------------------ Pallas kernels ------------------------------ #

def _make_conv_kernel(KH, KW, Wp, Ho, Wo, out_off, out_stride, mode,
                      res_off=0, res_stride=0):
    """Fused BN+ReLU -> KH*KW-tap stride-1 conv -> residual / shortcut epilogue.

    The input ref is a flattened, spatially padded (Hp*Wp, K) slab.  Each tap is
    a contiguous row window of the BN+ReLU'd slab ("wide" rows include junk
    edge columns that are discarded when emitting output rows), so everything
    stays 2-D.  The output is written directly in the consumer's padded slab
    layout (row r at out_off + r*out_stride), with the halo zeroed.
    """
    T = KH * KW

    def prologue(x_ref, m_ref, s_ref, b_ref, act_scr):
        # Folded BatchNorm + ReLU (f32), zero the spatial halo, cast bf16 once.
        act = jnp.maximum(
            x_ref[...].astype(jnp.float32) * s_ref[...] + b_ref[...], 0.0)
        act_scr[...] = (act * m_ref[...]).astype(act_scr.dtype)

    def conv_rows(act_scr, w_ref, emit_row):
        # Value-based tap accumulation over chunks of output rows: no per-tap
        # f32 accumulator read-modify-write through a VMEM scratch.
        for r0 in range(0, Ho, ROW_CHUNK):
            rows = min(ROW_CHUNK, Ho - r0)
            L = (rows - 1) * Wp + Wo
            acc = None
            for t in range(T):
                dh, dw = divmod(t, KW)
                start = (r0 + dh) * Wp + dw
                win = act_scr[start:start + L, :]
                part = jnp.dot(win, w_ref[t],
                               preferred_element_type=jnp.float32)
                acc = part if acc is None else acc + part
            for r in range(rows):
                emit_row(r0 + r, acc[r * Wp:r * Wp + Wo, :])

    def store_row(o_ref, r, row):
        a = out_off + r * out_stride
        o_ref[a:a + Wo, :] = row.astype(o_ref.dtype)

    if mode == "plain":
        def kernel(x_ref, m_ref, s_ref, b_ref, w_ref, o_ref, act_scr):
            prologue(x_ref, m_ref, s_ref, b_ref, act_scr)
            o_ref[...] = jnp.zeros(o_ref.shape, o_ref.dtype)      # zero halo
            conv_rows(act_scr, w_ref, lambda r, row: store_row(o_ref, r, row))

    elif mode == "res":
        def kernel(x_ref, m_ref, s_ref, b_ref, w_ref, r_ref, o_ref, act_scr):
            prologue(x_ref, m_ref, s_ref, b_ref, act_scr)
            o_ref[...] = jnp.zeros(o_ref.shape, o_ref.dtype)      # zero halo

            def emit(r, row):
                a = res_off + r * res_stride
                res = r_ref[a:a + Wo, :].astype(jnp.float32)
                store_row(o_ref, r, row + res)

            conv_rows(act_scr, w_ref, emit)

    else:  # "short": also emit the 1x1 shortcut projection (centre tap)
        def kernel(x_ref, m_ref, s_ref, b_ref, w_ref, ws_ref, o_ref, ro_ref,
                   act_scr):
            prologue(x_ref, m_ref, s_ref, b_ref, act_scr)
            o_ref[...] = jnp.zeros(o_ref.shape, o_ref.dtype)      # zero halo
            conv_rows(act_scr, w_ref, lambda r, row: store_row(o_ref, r, row))
            for r0 in range(0, Ho, ROW_CHUNK):
                rows = min(ROW_CHUNK, Ho - r0)
                L = (rows - 1) * Wp + Wo
                start = (r0 + 1) * Wp + 1
                acc = jnp.dot(act_scr[start:start + L, :], ws_ref[...],
                              preferred_element_type=jnp.float32)
                for r in range(rows):
                    ro_ref[(r0 + r) * Wo:(r0 + r + 1) * Wo, :] = (
                        acc[r * Wp:r * Wp + Wo, :].astype(ro_ref.dtype))

    return kernel


def fused_conv(x_slab, mask, scale, shift, w_taps, *, KH, KW, Wp, Ho, Wo,
               out_rows, out_off, out_stride,
               residual=None, res_off=0, res_stride=0, w_short=None):
    """Fused BN+ReLU + conv (+residual add or +1x1 shortcut second output)."""
    N, Min, K = x_slab.shape
    T, _, Cp = w_taps.shape
    assert T == KH * KW
    mode = ("res" if residual is not None
            else ("short" if w_short is not None else "plain"))

    kernel = _make_conv_kernel(KH, KW, Wp, Ho, Wo, out_off, out_stride, mode,
                               res_off, res_stride)

    x_spec = pl.BlockSpec((None, Min, K), lambda n: (n, 0, 0))
    m_spec = pl.BlockSpec((Min, 1), lambda n: (0, 0))
    v_spec = pl.BlockSpec((1, K), lambda n: (0, 0))
    w_spec = pl.BlockSpec((T, K, Cp), lambda n: (0, 0, 0))   # VMEM-resident
    o_spec = pl.BlockSpec((None, out_rows, Cp), lambda n: (n, 0, 0))

    in_specs = [x_spec, m_spec, v_spec, v_spec, w_spec]
    args = [x_slab, mask, scale, shift, w_taps]
    o_main = jax.ShapeDtypeStruct((N, out_rows, Cp), jnp.bfloat16)

    if mode == "res":
        in_specs.append(pl.BlockSpec((None, residual.shape[1], Cp),
                                     lambda n: (n, 0, 0)))
        args.append(residual)
        out_shape, out_specs = o_main, o_spec
    elif mode == "short":
        in_specs.append(pl.BlockSpec((K, Cp), lambda n: (0, 0)))
        args.append(w_short)
        ro_rows = Ho * Wo
        out_shape = (o_main,
                     jax.ShapeDtypeStruct((N, ro_rows, Cp), jnp.bfloat16))
        out_specs = (o_spec,
                     pl.BlockSpec((None, ro_rows, Cp), lambda n: (n, 0, 0)))
    else:
        out_shape, out_specs = o_main, o_spec

    # cost estimate
    n_chunks = -(-Ho // ROW_CHUNK)
    total_m = (Ho - n_chunks) * Wp + n_chunks * Wo
    n_mm = T + (1 if mode == "short" else 0)
    flops = int(2 * N * total_m * K * Cp * n_mm)
    res_bytes = int(residual.size * 2) if residual is not None else 0
    out_bytes = N * out_rows * Cp * 2 + (N * Ho * Wo * Cp * 2
                                         if mode == "short" else 0)
    w_bytes = int(w_taps.size * 2) + (int(w_short.size * 2)
                                      if w_short is not None else 0)
    bytes_accessed = int(x_slab.size * 2 + w_bytes + out_bytes + res_bytes +
                         mask.size * 4 + (scale.size + shift.size) * 4)

    # VMEM budget derived from the actual buffers (double-buffered blocks,
    # resident weights, bf16 activation scratch, value-accumulation temps).
    l0 = (min(ROW_CHUNK, Ho) - 1) * Wp + Wo
    need = (2 * (Min * K * 2 + out_bytes // N + res_bytes // N)
            + 2 * w_bytes + Min * K * 2 + 6 * l0 * Cp * 4 + (2 << 20))
    vmem_limit = int(min(64 << 20, max(32 << 20, need + (8 << 20))))

    return pl.pallas_call(
        kernel,
        grid=(N,),
        in_specs=in_specs,
        out_specs=out_specs,
        out_shape=out_shape,
        scratch_shapes=[pltpu.VMEM((Min, K), jnp.bfloat16)],  # BN+ReLU'd input
        compiler_params=pltpu.CompilerParams(
            dimension_semantics=("parallel",),
            vmem_limit_bytes=vmem_limit),
        cost_estimate=pl.CostEstimate(flops=flops, transcendentals=0,
                                      bytes_accessed=bytes_accessed),
    )(*args)


# ------------------------- NetworkBlock forward pass ------------------------ #

def basic_block_forward(slab, H, W, p):
    """slab: (N, (H+2)*(W+2), k_in) bf16, spatially padded (halo=1, zeros).

    Returns (out_slab, Ho, Wo) with out_slab in the same padded layout at the
    output resolution and p['cp'] channels.
    """
    N = slab.shape[0]
    stride, cin, cp, k1 = p['stride'], p['cin'], p['cp'], p['k1']
    Ho, Wo = H // stride, W // stride
    Hp2, Wp2 = Ho + 2, Wo + 2
    Min2 = Hp2 * Wp2

    if stride == 2:
        # space-to-depth (2x2 phases into channels) -> 3x3/s2 becomes 2x2/s1
        k_in = slab.shape[2]
        xin = slab.reshape(N, H + 2, W + 2, k_in)[:, 1:1 + H, 1:1 + W, :cin]
        xs = xin.reshape(N, Ho, 2, Wo, 2, cin).transpose(0, 1, 3, 2, 4, 5)
        xs = xs.reshape(N, Ho, Wo, 4 * cin)
        xs = _pad_channels(xs, k1)
        xs = jnp.pad(xs, ((0, 0), (1, 0), (1, 0), (0, 0)))
        Hp1, Wp1 = Ho + 1, Wo + 1
        x1 = xs.reshape(N, Hp1 * Wp1, k1)
        KH = KW = 2
    else:
        Hp1, Wp1 = H + 2, W + 2
        x1 = slab
        KH = KW = 3

    mask1 = _border_mask(Hp1, Wp1, Ho, Wo)

    if p['equal']:
        out1 = fused_conv(x1, mask1, p['bn1_scale'], p['bn1_shift'],
                          p['conv1_w'], KH=KH, KW=KW, Wp=Wp1, Ho=Ho, Wo=Wo,
                          out_rows=Min2, out_off=Wp2 + 1, out_stride=Wp2)
        res, r_off, r_stride = slab, Wp1 + 1, Wp1          # identity residual
    else:
        out1, res = fused_conv(x1, mask1, p['bn1_scale'], p['bn1_shift'],
                               p['conv1_w'], KH=KH, KW=KW, Wp=Wp1, Ho=Ho,
                               Wo=Wo, out_rows=Min2, out_off=Wp2 + 1,
                               out_stride=Wp2, w_short=p['short_w'])
        r_off, r_stride = 0, Wo                            # dense shortcut out

    # conv2: 3x3 stride 1 + bn2/relu prologue + residual add, output written in
    # the next block's padded slab layout (no XLA pad round trip).
    mask2 = _border_mask(Hp2, Wp2, Ho, Wo)
    out2 = fused_conv(out1, mask2, p['bn2_scale'], p['bn2_shift'],
                      p['conv2_w'], KH=3, KW=3, Wp=Wp2, Ho=Ho, Wo=Wo,
                      out_rows=Min2, out_off=Wp2 + 1, out_stride=Wp2,
                      residual=res, res_off=r_off, res_stride=r_stride)
    return out2, Ho, Wo


def network_block_forward(x_nchw, params, out_planes):
    N, C, H, W = x_nchw.shape
    x = jnp.transpose(x_nchw, (0, 2, 3, 1)).astype(jnp.bfloat16)  # NCHW->NHWC
    k0 = _round_up(C, LANE)
    x = _pad_channels(x, k0)
    slab = jnp.pad(x, ((0, 0), (1, 1), (1, 1), (0, 0)))
    slab = slab.reshape(N, (H + 2) * (W + 2), k0)
    for p in params:
        slab, H, W = basic_block_forward(slab, H, W, p)
    cp = params[-1]['cp']
    out = slab.reshape(N, H + 2, W + 2, cp)[:, 1:1 + H, 1:1 + W, :out_planes]
    return jnp.transpose(out.astype(jnp.float32), (0, 3, 1, 2))   # -> NCHW


# --------------------------- parameter preparation -------------------------- #

def _prep_layer(raw, cin, cout, stride, equal):
    """Pre-lay-out weights/BN params for the kernels (done once, at init)."""
    k1 = _round_up(4 * cin if stride == 2 else cin, LANE)
    cp = _round_up(cout, LANE)

    s1, b1 = raw['bn1_scale'], raw['bn1_shift']
    if stride == 2:
        s1, b1 = jnp.tile(s1, 4), jnp.tile(b1, 4)
    bn1_scale = jnp.pad(s1, (0, k1 - s1.shape[0])).reshape(1, k1)
    bn1_shift = jnp.pad(b1, (0, k1 - b1.shape[0])).reshape(1, k1)
    bn2_scale = jnp.pad(raw['bn2_scale'], (0, cp - cout)).reshape(1, cp)
    bn2_shift = jnp.pad(raw['bn2_shift'], (0, cp - cout)).reshape(1, cp)

    w1 = raw['conv1_w']                                  # (cout, cin, 3, 3)
    if stride == 2:
        # rearrange 3x3/stride-2 into 2x2 taps over 4*cin s2d channels
        w1t = jnp.zeros((2, 2, 4 * cin, cout), jnp.float32)
        for kh in range(3):
            dh, pr = (kh + 1) // 2, (kh + 1) % 2
            for kw in range(3):
                dw, pc = (kw + 1) // 2, (kw + 1) % 2
                blk = (pr * 2 + pc) * cin
                w1t = w1t.at[dh, dw, blk:blk + cin, :].set(w1[:, :, kh, kw].T)
        w1t = w1t.reshape(4, 4 * cin, cout)
    else:
        w1t = jnp.transpose(w1, (2, 3, 1, 0)).reshape(9, cin, cout)
    conv1_w = jnp.pad(w1t, ((0, 0), (0, k1 - w1t.shape[1]),
                            (0, cp - cout))).astype(jnp.bfloat16)

    w2t = jnp.transpose(raw['conv2_w'], (2, 3, 1, 0)).reshape(9, cout, cout)
    conv2_w = jnp.pad(w2t, ((0, 0), (0, cp - cout),
                            (0, cp - cout))).astype(jnp.bfloat16)

    short_w = None
    if not equal:
        ws = raw['short_w'].reshape(cout, cin).T         # (cin, cout)
        if stride == 2:
            full = jnp.zeros((4 * cin, cout), jnp.float32).at[:cin, :].set(ws)
        else:
            full = ws
        short_w = jnp.pad(full, ((0, k1 - full.shape[0]),
                                 (0, cp - cout))).astype(jnp.bfloat16)

    return dict(cin=cin, cout=cout, cp=cp, k1=k1, stride=stride, equal=equal,
                bn1_scale=bn1_scale, bn1_shift=bn1_shift,
                bn2_scale=bn2_scale, bn2_shift=bn2_shift,
                conv1_w=conv1_w, conv2_w=conv2_w, short_w=short_w)


def init_network_block(key, nb_layers, in_planes, out_planes, stride):
    params = []
    for i in range(nb_layers):
        c_in = in_planes if i == 0 else out_planes
        s = stride if i == 0 else 1
        equal = (c_in == out_planes)
        # identity residual with stride>1 is shape-mismatched; WRN never uses it
        assert not (equal and s != 1), "in==out with stride>1 is unsupported"
        ks = jax.random.split(jax.random.fold_in(key, i), 11)

        def bn(k4, c):
            gamma = 1.0 + 0.1 * jax.random.normal(k4[0], (c,))
            beta = 0.1 * jax.random.normal(k4[1], (c,))
            mean = 0.05 * jax.random.normal(k4[2], (c,))
            var = jax.random.uniform(k4[3], (c,), minval=0.5, maxval=1.5)
            scale = gamma / jnp.sqrt(var + 1e-5)
            shift = beta - mean * scale
            return scale.astype(jnp.float32), shift.astype(jnp.float32)

        bn1_scale, bn1_shift = bn(ks[0:4], c_in)
        bn2_scale, bn2_shift = bn(ks[4:8], out_planes)
        conv1_w = (jax.random.normal(ks[8], (out_planes, c_in, 3, 3))
                   * (2.0 / (9 * c_in)) ** 0.5).astype(jnp.float32)
        conv2_w = (jax.random.normal(ks[9], (out_planes, out_planes, 3, 3))
                   * (2.0 / (9 * out_planes)) ** 0.5).astype(jnp.float32)
        raw = dict(bn1_scale=bn1_scale, bn1_shift=bn1_shift,
                   bn2_scale=bn2_scale, bn2_shift=bn2_shift,
                   conv1_w=conv1_w, conv2_w=conv2_w,
                   stride=s, equal=equal, short_w=None)
        if not equal:
            raw['short_w'] = (jax.random.normal(ks[10],
                                                (out_planes, c_in, 1, 1))
                              * (2.0 / c_in) ** 0.5).astype(jnp.float32)
        layer = _prep_layer(raw, c_in, out_planes, s, equal)
        layer['raw'] = raw
        params.append(layer)
    return params


# -------------------------------- JAX reference ------------------------------ #

def _conv_ref(x, w_oihw, stride, pad):
    w_hwio = jnp.transpose(w_oihw, (2, 3, 1, 0))
    return jax.lax.conv_general_dilated(
        x, w_hwio, (stride, stride), [(pad, pad), (pad, pad)],
        dimension_numbers=('NHWC', 'HWIO', 'NHWC'))


def _block_ref(x, raw):
    act = jnp.maximum(x * raw['bn1_scale'] + raw['bn1_shift'], 0.0)
    out = _conv_ref(act, raw['conv1_w'], raw['stride'], 1)
    out = jnp.maximum(out * raw['bn2_scale'] + raw['bn2_shift'], 0.0)
    out = _conv_ref(out, raw['conv2_w'], 1, 1)
    res = x if raw['equal'] else _conv_ref(act, raw['short_w'], raw['stride'], 0)
    return res + out


# ------------------------------------ main ----------------------------------- #

if __name__ == "__main__":
    key = jax.random.PRNGKey(0)
    N, H, W = 2, 16, 16
    configs = [
        dict(nb_layers=2, in_planes=4, out_planes=8, stride=2),  # downsampling
        dict(nb_layers=1, in_planes=4, out_planes=8, stride=1),  # expand, s=1
    ]
    for idx, cfg in enumerate(configs):
        kcfg = jax.random.fold_in(key, idx)
        x_nchw = jax.random.normal(jax.random.fold_in(kcfg, 999),
                                   (N, cfg['in_planes'], H, W),
                                   dtype=jnp.float32)
        params = init_network_block(kcfg, cfg['nb_layers'], cfg['in_planes'],
                                    cfg['out_planes'], cfg['stride'])

        out_nchw = network_block_forward(x_nchw, params, cfg['out_planes'])
        out_nchw = jax.block_until_ready(out_nchw)
        s = cfg['stride']
        assert out_nchw.shape == (N, cfg['out_planes'], H // s, W // s), \
            out_nchw.shape

        # pure-f32 JAX reference (kernel uses bf16 operands/intermediates with
        # f32 accumulation, hence the loose-ish tolerance).
        ref = jnp.transpose(x_nchw, (0, 2, 3, 1))
        for p in params:
            ref = _block_ref(ref, p['raw'])
        ref_nchw = jnp.transpose(ref, (0, 3, 1, 2))
        np.testing.assert_allclose(np.asarray(out_nchw), np.asarray(ref_nchw),
                                   atol=8e-2, rtol=8e-2)

    print("KERNEL_OK")
</pallas_src>

<mosaic_0001>
module attributes {stable_mosaic.version = 11 : i64} {
  func.func @kernel(%arg0: i32, %arg1: memref<1x81x128xbf16, #tpu.memory_space<vmem>>, %arg2: memref<81x1xf32, #tpu.memory_space<vmem>>, %arg3: memref<1x128xf32, #tpu.memory_space<vmem>>, %arg4: memref<1x128xf32, #tpu.memory_space<vmem>>, %arg5: memref<4x128x128xbf16, #tpu.memory_space<vmem>>, %arg6: memref<128x128xbf16, #tpu.memory_space<vmem>>, %arg7: memref<1x100x128xbf16, #tpu.memory_space<vmem>>, %arg8: memref<1x64x128xbf16, #tpu.memory_space<vmem>>, %arg9: memref<81x128xbf16, #tpu.memory_space<vmem>>) attributes {dimension_semantics = [#tpu.dimension_semantics<parallel>], iteration_bounds = array<i64: 2>, scalar_prefetch = 0 : i64, scratch_operands = 1 : i64, tpu.core_type = #tpu.core_type<tc>, window_params = [{transform_indices = @transform_0, window_bounds = array<i64: 1, 81, 128>}, {pipeline_mode = #tpu.pipeline_mode<synchronous>, transform_indices = @transform_1, window_bounds = array<i64: 81, 1>}, {pipeline_mode = #tpu.pipeline_mode<synchronous>, transform_indices = @transform_2, window_bounds = array<i64: 1, 128>}, {pipeline_mode = #tpu.pipeline_mode<synchronous>, transform_indices = @transform_3, window_bounds = array<i64: 1, 128>}, {pipeline_mode = #tpu.pipeline_mode<synchronous>, transform_indices = @transform_4, window_bounds = array<i64: 4, 128, 128>}, {pipeline_mode = #tpu.pipeline_mode<synchronous>, transform_indices = @transform_5, window_bounds = array<i64: 128, 128>}, {transform_indices = @transform_6, window_bounds = array<i64: 1, 100, 128>}, {transform_indices = @transform_7, window_bounds = array<i64: 1, 64, 128>}]} {
    %c0 = arith.constant 0 : index
    %c0_0 = arith.constant 0 : index
    %c0_1 = arith.constant 0 : index
    %0 = vector.load %arg1[%c0, %c0_0, %c0_1] : memref<1x81x128xbf16, #tpu.memory_space<vmem>>, vector<1x81x128xbf16>
    %1 = vector.shape_cast %0 : vector<1x81x128xbf16> to vector<81x128xbf16>
    %2 = arith.extf %1 : vector<81x128xbf16> to vector<81x128xf32>
    %c0_2 = arith.constant 0 : index
    %c0_3 = arith.constant 0 : index
    %3 = vector.load %arg3[%c0_2, %c0_3] : memref<1x128xf32, #tpu.memory_space<vmem>>, vector<1x128xf32>
    %4 = vector.broadcast %3 : vector<1x128xf32> to vector<81x128xf32>
    %5 = arith.mulf %2, %4 : vector<81x128xf32>
    %c0_4 = arith.constant 0 : index
    %c0_5 = arith.constant 0 : index
    %6 = vector.load %arg4[%c0_4, %c0_5] : memref<1x128xf32, #tpu.memory_space<vmem>>, vector<1x128xf32>
    %7 = vector.broadcast %6 : vector<1x128xf32> to vector<81x128xf32>
    %8 = arith.addf %5, %7 : vector<81x128xf32>
    %cst = arith.constant 0.000000e+00 : f32
    %9 = vector.broadcast %cst : f32 to vector<81x128xf32>
    %10 = arith.maximumf %8, %9 : vector<81x128xf32>
    %c0_6 = arith.constant 0 : index
    %c0_7 = arith.constant 0 : index
    %11 = vector.load %arg2[%c0_6, %c0_7] : memref<81x1xf32, #tpu.memory_space<vmem>>, vector<81x1xf32>
    %12 = vector.broadcast %11 : vector<81x1xf32> to vector<81x128xf32>
    %13 = arith.mulf %10, %12 : vector<81x128xf32>
    %14 = arith.truncf %13 : vector<81x128xf32> to vector<81x128xbf16>
    %c0_8 = arith.constant 0 : index
    %c0_9 = arith.constant 0 : index
    %15 = vector.load %arg9[%c0_8, %c0_9] : memref<81x128xbf16, #tpu.memory_space<vmem>>, vector<81x128xbf16>
    tpu.vector_store %arg9[%c0_8, %c0_9], %14 {strides = array<i32>} : memref<81x128xbf16, #tpu.memory_space<vmem>>, vector<81x128xbf16>,
    %cst_10 = arith.constant 0.000000e+00 : bf16
    %16 = vector.broadcast %cst_10 : bf16 to vector<100x128xbf16>
    %c0_11 = arith.constant 0 : index
    %c0_12 = arith.constant 0 : index
    %c0_13 = arith.constant 0 : index
    %17 = vector.load %arg7[%c0_11, %c0_12, %c0_13] : memref<1x100x128xbf16, #tpu.memory_space<vmem>>, vector<1x100x128xbf16>
    %18 = vector.shape_cast %17 : vector<1x100x128xbf16> to vector<100x128xbf16>
    %19 = vector.shape_cast %16 : vector<100x128xbf16> to vector<1x100x128xbf16>
    tpu.vector_store %arg7[%c0_11, %c0_12, %c0_13], %19 {strides = array<i32>} : memref<1x100x128xbf16, #tpu.memory_space<vmem>>, vector<1x100x128xbf16>,
    %c0_14 = arith.constant 0 : index
    %c0_15 = arith.constant 0 : index
    %20 = vector.load %arg9[%c0_14, %c0_15] : memref<81x128xbf16, #tpu.memory_space<vmem>>, vector<71x128xbf16>
    %c0_16 = arith.constant 0 : index
    %c0_17 = arith.constant 0 : index
    %c0_18 = arith.constant 0 : index
    %21 = vector.load %arg5[%c0_16, %c0_17, %c0_18] : memref<4x128x128xbf16, #tpu.memory_space<vmem>>, vector<1x128x128xbf16>
    %22 = vector.shape_cast %21 : vector<1x128x128xbf16> to vector<128x128xbf16>
    %cst_19 = arith.constant dense<0.000000e+00> : vector<71x128xf32>
    %23 = tpu.matmul %20, %22, %cst_19 {dimension_numbers = #tpu.dot_dimension_numbers<[1], [0], [0], [1], [0, 0, 1, 1], [], []>} : vector<71x128xbf16>, vector<128x128xbf16>, vector<71x128xf32> -> vector<71x128xf32>
    %c1 = arith.constant 1 : index
    %c0_20 = arith.constant 0 : index
    %24 = vector.load %arg9[%c1, %c0_20] : memref<81x128xbf16, #tpu.memory_space<vmem>>, vector<71x128xbf16>
    %c1_21 = arith.constant 1 : index
    %c0_22 = arith.constant 0 : index
    %c0_23 = arith.constant 0 : index
    %25 = vector.load %arg5[%c1_21, %c0_22, %c0_23] : memref<4x128x128xbf16, #tpu.memory_space<vmem>>, vector<1x128x128xbf16>
    %26 = vector.shape_cast %25 : vector<1x128x128xbf16> to vector<128x128xbf16>
    %cst_24 = arith.constant dense<0.000000e+00> : vector<71x128xf32>
    %27 = tpu.matmul %24, %26, %cst_24 {dimension_numbers = #tpu.dot_dimension_numbers<[1], [0], [0], [1], [0, 0, 1, 1], [], []>} : vector<71x128xbf16>, vector<128x128xbf16>, vector<71x128xf32> -> vector<71x128xf32>
    %28 = arith.addf %23, %27 : vector<71x128xf32>
    %c9 = arith.constant 9 : index
    %c0_25 = arith.constant 0 : index
    %29 = vector.load %arg9[%c9, %c0_25] : memref<81x128xbf16, #tpu.memory_space<vmem>>, vector<71x128xbf16>
    %c2 = arith.constant 2 : index
    %c0_26 = arith.constant 0 : index
    %c0_27 = arith.constant 0 : index
    %30 = vector.load %arg5[%c2, %c0_26, %c0_27] : memref<4x128x128xbf16, #tpu.memory_space<vmem>>, vector<1x128x128xbf16>
    %31 = vector.shape_cast %30 : vector<1x128x128xbf16> to vector<128x128xbf16>
    %cst_28 = arith.constant dense<0.000000e+00> : vector<71x128xf32>
    %32 = tpu.matmul %29, %31, %cst_28 {dimension_numbers = #tpu.dot_dimension_numbers<[1], [0], [0], [1], [0, 0, 1, 1], [], []>} : vector<71x128xbf16>, vector<128x128xbf16>, vector<71x128xf32> -> vector<71x128xf32>
    %33 = arith.addf %28, %32 : vector<71x128xf32>
    %c10 = arith.constant 10 : index
    %c0_29 = arith.constant 0 : index
    %34 = vector.load %arg9[%c10, %c0_29] : memref<81x128xbf16, #tpu.memory_space<vmem>>, vector<71x128xbf16>
    %c3 = arith.constant 3 : index
    %c0_30 = arith.constant 0 : index
    %c0_31 = arith.constant 0 : index
    %35 = vector.load %arg5[%c3, %c0_30, %c0_31] : memref<4x128x128xbf16, #tpu.memory_space<vmem>>, vector<1x128x128xbf16>
    %36 = vector.shape_cast %35 : vector<1x128x128xbf16> to vector<128x128xbf16>
    %cst_32 = arith.constant dense<0.000000e+00> : vector<71x128xf32>
    %37 = tpu.matmul %34, %36, %cst_32 {dimension_numbers = #tpu.dot_dimension_numbers<[1], [0], [0], [1], [0, 0, 1, 1], [], []>} : vector<71x128xbf16>, vector<128x128xbf16>, vector<71x128xf32> -> vector<71x128xf32>
    %38 = arith.addf %33, %37 : vector<71x128xf32>
    %39 = vector.extract_strided_slice %38 {offsets = [0, 0], sizes = [8, 128], strides = [1, 1]} : vector<71x128xf32> to vector<8x128xf32>
    %40 = arith.truncf %39 : vector<8x128xf32> to vector<8x128xbf16>
    %c0_33 = arith.constant 0 : index
    %c11 = arith.constant 11 : index
    %c0_34 = arith.constant 0 : index
    %41 = vector.load %arg7[%c0_33, %c11, %c0_34] : memref<1x100x128xbf16, #tpu.memory_space<vmem>>, vector<1x8x128xbf16>
    %42 = vector.shape_cast %41 : vector<1x8x128xbf16> to vector<8x128xbf16>
    %43 = vector.shape_cast %40 : vector<8x128xbf16> to vector<1x8x128xbf16>
    tpu.vector_store %arg7[%c0_33, %c11, %c0_34], %43 {strides = array<i32>} : memref<1x100x128xbf16, #tpu.memory_space<vmem>>, vector<1x8x128xbf16>,
    %44 = vector.extract_strided_slice %38 {offsets = [9, 0], sizes = [8, 128], strides = [1, 1]} : vector<71x128xf32> to vector<8x128xf32>
    %45 = arith.truncf %44 : vector<8x128xf32> to vector<8x128xbf16>
    %c0_35 = arith.constant 0 : index
    %c21 = arith.constant 21 : index
    %c0_36 = arith.constant 0 : index
    %46 = vector.load %arg7[%c0_35, %c21, %c0_36] : memref<1x100x128xbf16, #tpu.memory_space<vmem>>, vector<1x8x128xbf16>
    %47 = vector.shape_cast %46 : vector<1x8x128xbf16> to vector<8x128xbf16>
    %48 = vector.shape_cast %45 : vector<8x128xbf16> to vector<1x8x128xbf16>
    tpu.vector_store %arg7[%c0_35, %c21, %c0_36], %48 {strides = array<i32>} : memref<1x100x128xbf16, #tpu.memory_space<vmem>>, vector<1x8x128xbf16>,
    %49 = vector.extract_strided_slice %38 {offsets = [18, 0], sizes = [8, 128], strides = [1, 1]} : vector<71x128xf32> to vector<8x128xf32>
    %50 = arith.truncf %49 : vector<8x128xf32> to vector<8x128xbf16>
    %c0_37 = arith.constant 0 : index
    %c31 = arith.constant 31 : index
    %c0_38 = arith.constant 0 : index
    %51 = vector.load %arg7[%c0_37, %c31, %c0_38] : memref<1x100x128xbf16, #tpu.memory_space<vmem>>, vector<1x8x128xbf16>
    %52 = vector.shape_cast %51 : vector<1x8x128xbf16> to vector<8x128xbf16>
    %53 = vector.shape_cast %50 : vector<8x128xbf16> to vector<1x8x128xbf16>
    tpu.vector_store %arg7[%c0_37, %c31, %c0_38], %53 {strides = array<i32>} : memref<1x100x128xbf16, #tpu.memory_space<vmem>>, vector<1x8x128xbf16>,
    %54 = vector.extract_strided_slice %38 {offsets = [27, 0], sizes = [8, 128], strides = [1, 1]} : vector<71x128xf32> to vector<8x128xf32>
    %55 = arith.truncf %54 : vector<8x128xf32> to vector<8x128xbf16>
    %c0_39 = arith.constant 0 : index
    %c41 = arith.constant 41 : index
    %c0_40 = arith.constant 0 : index
    %56 = vector.load %arg7[%c0_39, %c41, %c0_40] : memref<1x100x128xbf16, #tpu.memory_space<vmem>>, vector<1x8x128xbf16>
    %57 = vector.shape_cast %56 : vector<1x8x128xbf16> to vector<8x128xbf16>
    %58 = vector.shape_cast %55 : vector<8x128xbf16> to vector<1x8x128xbf16>
    tpu.vector_store %arg7[%c0_39, %c41, %c0_40], %58 {strides = array<i32>} : memref<1x100x128xbf16, #tpu.memory_space<vmem>>, vector<1x8x128xbf16>,
    %59 = vector.extract_strided_slice %38 {offsets = [36, 0], sizes = [8, 128], strides = [1, 1]} : vector<71x128xf32> to vector<8x128xf32>
    %60 = arith.truncf %59 : vector<8x128xf32> to vector<8x128xbf16>
    %c0_41 = arith.constant 0 : index
    %c51 = arith.constant 51 : index
    %c0_42 = arith.constant 0 : index
    %61 = vector.load %arg7[%c0_41, %c51, %c0_42] : memref<1x100x128xbf16, #tpu.memory_space<vmem>>, vector<1x8x128xbf16>
    %62 = vector.shape_cast %61 : vector<1x8x128xbf16> to vector<8x128xbf16>
    %63 = vector.shape_cast %60 : vector<8x128xbf16> to vector<1x8x128xbf16>
    tpu.vector_store %arg7[%c0_41, %c51, %c0_42], %63 {strides = array<i32>} : memref<1x100x128xbf16, #tpu.memory_space<vmem>>, vector<1x8x128xbf16>,
    %64 = vector.extract_strided_slice %38 {offsets = [45, 0], sizes = [8, 128], strides = [1, 1]} : vector<71x128xf32> to vector<8x128xf32>
    %65 = arith.truncf %64 : vector<8x128xf32> to vector<8x128xbf16>
    %c0_43 = arith.constant 0 : index
    %c61 = arith.constant 61 : index
    %c0_44 = arith.constant 0 : index
    %66 = vector.load %arg7[%c0_43, %c61, %c0_44] : memref<1x100x128xbf16, #tpu.memory_space<vmem>>, vector<1x8x128xbf16>
    %67 = vector.shape_cast %66 : vector<1x8x128xbf16> to vector<8x128xbf16>
    %68 = vector.shape_cast %65 : vector<8x128xbf16> to vector<1x8x128xbf16>
    tpu.vector_store %arg7[%c0_43, %c61, %c0_44], %68 {strides = array<i32>} : memref<1x100x128xbf16, #tpu.memory_space<vmem>>, vector<1x8x128xbf16>,
    %69 = vector.extract_strided_slice %38 {offsets = [54, 0], sizes = [8, 128], strides = [1, 1]} : vector<71x128xf32> to vector<8x128xf32>
    %70 = arith.truncf %69 : vector<8x128xf32> to vector<8x128xbf16>
    %c0_45 = arith.constant 0 : index
    %c71 = arith.constant 71 : index
    %c0_46 = arith.constant 0 : index
    %71 = vector.load %arg7[%c0_45, %c71, %c0_46] : memref<1x100x128xbf16, #tpu.memory_space<vmem>>, vector<1x8x128xbf16>
    %72 = vector.shape_cast %71 : vector<1x8x128xbf16> to vector<8x128xbf16>
    %73 = vector.shape_cast %70 : vector<8x128xbf16> to vector<1x8x128xbf16>
    tpu.vector_store %arg7[%c0_45, %c71, %c0_46], %73 {strides = array<i32>} : memref<1x100x128xbf16, #tpu.memory_space<vmem>>, vector<1x8x128xbf16>,
    %74 = vector.extract_strided_slice %38 {offsets = [63, 0], sizes = [8, 128], strides = [1, 1]} : vector<71x128xf32> to vector<8x128xf32>
    %75 = arith.truncf %74 : vector<8x128xf32> to vector<8x128xbf16>
    %c0_47 = arith.constant 0 : index
    %c81 = arith.constant 81 : index
    %c0_48 = arith.constant 0 : index
    %76 = vector.load %arg7[%c0_47, %c81, %c0_48] : memref<1x100x128xbf16, #tpu.memory_space<vmem>>, vector<1x8x128xbf16>
    %77 = vector.shape_cast %76 : vector<1x8x128xbf16> to vector<8x128xbf16>
    %78 = vector.shape_cast %75 : vector<8x128xbf16> to vector<1x8x128xbf16>
    tpu.vector_store %arg7[%c0_47, %c81, %c0_48], %78 {strides = array<i32>} : memref<1x100x128xbf16, #tpu.memory_space<vmem>>, vector<1x8x128xbf16>,
    %c10_49 = arith.constant 10 : index
    %c0_50 = arith.constant 0 : index
    %79 = vector.load %arg9[%c10_49, %c0_50] : memref<81x128xbf16, #tpu.memory_space<vmem>>, vector<71x128xbf16>
    %c0_51 = arith.constant 0 : index
    %c0_52 = arith.constant 0 : index
    %80 = vector.load %arg6[%c0_51, %c0_52] : memref<128x128xbf16, #tpu.memory_space<vmem>>, vector<128x128xbf16>
    %cst_53 = arith.constant dense<0.000000e+00> : vector<71x128xf32>
    %81 = tpu.matmul %79, %80, %cst_53 {dimension_numbers = #tpu.dot_dimension_numbers<[1], [0], [0], [1], [0, 0, 1, 1], [], []>} : vector<71x128xbf16>, vector<128x128xbf16>, vector<71x128xf32> -> vector<71x128xf32>
    %82 = vector.extract_strided_slice %81 {offsets = [0, 0], sizes = [8, 128], strides = [1, 1]} : vector<71x128xf32> to vector<8x128xf32>
    %83 = arith.truncf %82 : vector<8x128xf32> to vector<8x128xbf16>
    %c0_54 = arith.constant 0 : index
    %c0_55 = arith.constant 0 : index
    %c0_56 = arith.constant 0 : index
    %84 = vector.load %arg8[%c0_54, %c0_55, %c0_56] : memref<1x64x128xbf16, #tpu.memory_space<vmem>>, vector<1x8x128xbf16>
    %85 = vector.shape_cast %84 : vector<1x8x128xbf16> to vector<8x128xbf16>
    %86 = vector.shape_cast %83 : vector<8x128xbf16> to vector<1x8x128xbf16>
    tpu.vector_store %arg8[%c0_54, %c0_55, %c0_56], %86 {strides = array<i32>} : memref<1x64x128xbf16, #tpu.memory_space<vmem>>, vector<1x8x128xbf16>,
    %87 = vector.extract_strided_slice %81 {offsets = [9, 0], sizes = [8, 128], strides = [1, 1]} : vector<71x128xf32> to vector<8x128xf32>
    %88 = arith.truncf %87 : vector<8x128xf32> to vector<8x128xbf16>
    %c0_57 = arith.constant 0 : index
    %c8 = arith.constant 8 : index
    %c0_58 = arith.constant 0 : index
    %89 = vector.load %arg8[%c0_57, %c8, %c0_58] : memref<1x64x128xbf16, #tpu.memory_space<vmem>>, vector<1x8x128xbf16>
    %90 = vector.shape_cast %89 : vector<1x8x128xbf16> to vector<8x128xbf16>
    %91 = vector.shape_cast %88 : vector<8x128xbf16> to vector<1x8x128xbf16>
    tpu.vector_store %arg8[%c0_57, %c8, %c0_58], %91 {strides = array<i32>} : memref<1x64x128xbf16, #tpu.memory_space<vmem>>, vector<1x8x128xbf16>,
    %92 = vector.extract_strided_slice %81 {offsets = [18, 0], sizes = [8, 128], strides = [1, 1]} : vector<71x128xf32> to vector<8x128xf32>
    %93 = arith.truncf %92 : vector<8x128xf32> to vector<8x128xbf16>
    %c0_59 = arith.constant 0 : index
    %c16 = arith.constant 16 : index
    %c0_60 = arith.constant 0 : index
    %94 = vector.load %arg8[%c0_59, %c16, %c0_60] : memref<1x64x128xbf16, #tpu.memory_space<vmem>>, vector<1x8x128xbf16>
    %95 = vector.shape_cast %94 : vector<1x8x128xbf16> to vector<8x128xbf16>
    %96 = vector.shape_cast %93 : vector<8x128xbf16> to vector<1x8x128xbf16>
    tpu.vector_store %arg8[%c0_59, %c16, %c0_60], %96 {strides = array<i32>} : memref<1x64x128xbf16, #tpu.memory_space<vmem>>, vector<1x8x128xbf16>,
    %97 = vector.extract_strided_slice %81 {offsets = [27, 0], sizes = [8, 128], strides = [1, 1]} : vector<71x128xf32> to vector<8x128xf32>
    %98 = arith.truncf %97 : vector<8x128xf32> to vector<8x128xbf16>
    %c0_61 = arith.constant 0 : index
    %c24 = arith.constant 24 : index
    %c0_62 = arith.constant 0 : index
    %99 = vector.load %arg8[%c0_61, %c24, %c0_62] : memref<1x64x128xbf16, #tpu.memory_space<vmem>>, vector<1x8x128xbf16>
    %100 = vector.shape_cast %99 : vector<1x8x128xbf16> to vector<8x128xbf16>
    %101 = vector.shape_cast %98 : vector<8x128xbf16> to vector<1x8x128xbf16>
    tpu.vector_store %arg8[%c0_61, %c24, %c0_62], %101 {strides = array<i32>} : memref<1x64x128xbf16, #tpu.memory_space<vmem>>, vector<1x8x128xbf16>,
    %102 = vector.extract_strided_slice %81 {offsets = [36, 0], sizes = [8, 128], strides = [1, 1]} : vector<71x128xf32> to vector<8x128xf32>
    %103 = arith.truncf %102 : vector<8x128xf32> to vector<8x128xbf16>
    %c0_63 = arith.constant 0 : index
    %c32 = arith.constant 32 : index
    %c0_64 = arith.constant 0 : index
    %104 = vector.load %arg8[%c0_63, %c32, %c0_64] : memref<1x64x128xbf16, #tpu.memory_space<vmem>>, vector<1x8x128xbf16>
    %105 = vector.shape_cast %104 : vector<1x8x128xbf16> to vector<8x128xbf16>
    %106 = vector.shape_cast %103 : vector<8x128xbf16> to vector<1x8x128xbf16>
    tpu.vector_store %arg8[%c0_63, %c32, %c0_64], %106 {strides = array<i32>} : memref<1x64x128xbf16, #tpu.memory_space<vmem>>, vector<1x8x128xbf16>,
    %107 = vector.extract_strided_slice %81 {offsets = [45, 0], sizes = [8, 128], strides = [1, 1]} : vector<71x128xf32> to vector<8x128xf32>
    %108 = arith.truncf %107 : vector<8x128xf32> to vector<8x128xbf16>
    %c0_65 = arith.constant 0 : index
    %c40 = arith.constant 40 : index
    %c0_66 = arith.constant 0 : index
    %109 = vector.load %arg8[%c0_65, %c40, %c0_66] : memref<1x64x128xbf16, #tpu.memory_space<vmem>>, vector<1x8x128xbf16>
    %110 = vector.shape_cast %109 : vector<1x8x128xbf16> to vector<8x128xbf16>
    %111 = vector.shape_cast %108 : vector<8x128xbf16> to vector<1x8x128xbf16>
    tpu.vector_store %arg8[%c0_65, %c40, %c0_66], %111 {strides = array<i32>} : memref<1x64x128xbf16, #tpu.memory_space<vmem>>, vector<1x8x128xbf16>,
    %112 = vector.extract_strided_slice %81 {offsets = [54, 0], sizes = [8, 128], strides = [1, 1]} : vector<71x128xf32> to vector<8x128xf32>
    %113 = arith.truncf %112 : vector<8x128xf32> to vector<8x128xbf16>
    %c0_67 = arith.constant 0 : index
    %c48 = arith.constant 48 : index
    %c0_68 = arith.constant 0 : index
    %114 = vector.load %arg8[%c0_67, %c48, %c0_68] : memref<1x64x128xbf16, #tpu.memory_space<vmem>>, vector<1x8x128xbf16>
    %115 = vector.shape_cast %114 : vector<1x8x128xbf16> to vector<8x128xbf16>
    %116 = vector.shape_cast %113 : vector<8x128xbf16> to vector<1x8x128xbf16>
    tpu.vector_store %arg8[%c0_67, %c48, %c0_68], %116 {strides = array<i32>} : memref<1x64x128xbf16, #tpu.memory_space<vmem>>, vector<1x8x128xbf16>,
    %117 = vector.extract_strided_slice %81 {offsets = [63, 0], sizes = [8, 128], strides = [1, 1]} : vector<71x128xf32> to vector<8x128xf32>
    %118 = arith.truncf %117 : vector<8x128xf32> to vector<8x128xbf16>
    %c0_69 = arith.constant 0 : index
    %c56 = arith.constant 56 : index
    %c0_70 = arith.constant 0 : index
    %119 = vector.load %arg8[%c0_69, %c56, %c0_70] : memref<1x64x128xbf16, #tpu.memory_space<vmem>>, vector<1x8x128xbf16>
    %120 = vector.shape_cast %119 : vector<1x8x128xbf16> to vector<8x128xbf16>
    %121 = vector.shape_cast %118 : vector<8x128xbf16> to vector<1x8x128xbf16>
    tpu.vector_store %arg8[%c0_69, %c56, %c0_70], %121 {strides = array<i32>} : memref<1x64x128xbf16, #tpu.memory_space<vmem>>, vector<1x8x128xbf16>,
    return
  }
  func.func @transform_0(%arg0: i32) -> (i32, i32, i32) {
    %c0_i32 = arith.constant 0 : i32
    %c0_i32_0 = arith.constant 0 : i32
    %c0_i32_1 = arith.constant 0 : i32
    return %arg0, %c0_i32, %c0_i32_0 : i32, i32, i32
  }
  func.func @transform_1(%arg0: i32) -> (i32, i32) {
    %c0_i32 = arith.constant 0 : i32
    %c0_i32_0 = arith.constant 0 : i32
    %c0_i32_1 = arith.constant 0 : i32
    return %c0_i32, %c0_i32_0 : i32, i32
  }
  func.func @transform_2(%arg0: i32) -> (i32, i32) {
    %c0_i32 = arith.constant 0 : i32
    %c0_i32_0 = arith.constant 0 : i32
    %c0_i32_1 = arith.constant 0 : i32
    return %c0_i32, %c0_i32_0 : i32, i32
  }
  func.func @transform_3(%arg0: i32) -> (i32, i32) {
    %c0_i32 = arith.constant 0 : i32
    %c0_i32_0 = arith.constant 0 : i32
    %c0_i32_1 = arith.constant 0 : i32
    return %c0_i32, %c0_i32_0 : i32, i32
  }
  func.func @transform_4(%arg0: i32) -> (i32, i32, i32) {
    %c0_i32 = arith.constant 0 : i32
    %c0_i32_0 = arith.constant 0 : i32
    %c0_i32_1 = arith.constant 0 : i32
    %c0_i32_2 = arith.constant 0 : i32
    return %c0_i32, %c0_i32_0, %c0_i32_1 : i32, i32, i32
  }
  func.func @transform_5(%arg0: i32) -> (i32, i32) {
    %c0_i32 = arith.constant 0 : i32
    %c0_i32_0 = arith.constant 0 : i32
    %c0_i32_1 = arith.constant 0 : i32
    return %c0_i32, %c0_i32_0 : i32, i32
  }
  func.func @transform_6(%arg0: i32) -> (i32, i32, i32) {
    %c0_i32 = arith.constant 0 : i32
    %c0_i32_0 = arith.constant 0 : i32
    %c0_i32_1 = arith.constant 0 : i32
    return %arg0, %c0_i32, %c0_i32_0 : i32, i32, i32
  }
  func.func @transform_7(%arg0: i32) -> (i32, i32, i32) {
    %c0_i32 = arith.constant 0 : i32
    %c0_i32_0 = arith.constant 0 : i32
    %c0_i32_1 = arith.constant 0 : i32
    return %arg0, %c0_i32, %c0_i32_0 : i32, i32, i32
  }
}

</mosaic_0001>

<bundles_post_ra>
// kernel: tpu_custom_call.1
= control target key start
LH: loop header
LB: loop body
LE: loop exit
PB: predicated region body
PF: predicated region fallthrough
CT: control target
= control target key end

     0   :  { %13 = vsyncpa [#allocation4], 0  ;;  %s3473_s0 = inlined_call_operand.vmem [shape: bf16[2,81,128], index: 0, kind: input, shape index: {}]   ;;  %s3474_s1 = inlined_call_operand.vmem [shape: f32[81,1], index: 1, kind: input, shape index: {}]   ;;  %s3475_s2 = inlined_call_operand.vmem [shape: f32[1,128], index: 2, kind: input, shape index: {}]   ;;  %s3476_s3 = inlined_call_operand.vmem [shape: f32[1,128], index: 3, kind: input, shape index: {}]   ;;  %s3477_s4 = inlined_call_operand.vmem [shape: bf16[4,128,128], index: 4, kind: input, shape index: {}]   ;;  %s3478_s5 = inlined_call_operand.hbm [shape: bf16[128,128], index: 5, kind: input, shape index: {}]   ;;  %s3479_s6 = inlined_call_operand.vmem [shape: bf16[2,100,128], index: 6, kind: output, shape index: {0}]   ;;  %s3480_s7 = inlined_call_operand.hbm [shape: bf16[2,64,128], index: 7, kind: output, shape index: {1}]  }
   0x1   :  { %14 = vsyncpa [#allocation5], 0 }
   0x2   :  { %16 = vsyncpa [#allocation5 + $0x1], 0  ;;  %s2798_s24 = smov 0   ;;  %s2800_s25 = smov 0  }
   0x3   :  { %s2802_s26 = smov 0   ;;  %s2804_s27 = smov 0  }
   0x4 LB: > { %s2819_s28 = sadd.s32 4294967295, %s2747_s27   ;;  %s1957_s29 = sadd.s32 4294967294, %s2747_s27   ;;  %s2747_s27 = sphi %s2804_s27, %s3533_s27   ;;  %s2743_s26 = sphi %s2802_s26, %s3532_s26   ;;  %s2739_s25 = sphi %s2800_s25, %s3531_s25   ;;  %s2735_s24 = sphi %s2798_s24, %s3530_s24  }
   0x5   : > { %s2823_s30 = sadd.s32 1, %s2747_s27   ;;  %s186_s8 = sadd.s32 1, %s2743_s26 }
   0x6   : > { %s183_s9 = ssub.s32 %s2747_s27, %s2823_s30  ;;  %p196_p0 = scmp.ne.s32.totalorder %s2743_s26, %s2739_s25 }
   0x7   : > { %p184_p1 = scmp.eq.s32.totalorder %s183_s9, 0  ;;  %p197_p2 = scmp.eq.s32.totalorder %s2819_s28, 1 }
   0x8   : > { %p202_p3 = scmp.ne.s32.totalorder %s2739_s25, %s2735_s24  ;;  %p203_p4 = scmp.eq.s32.totalorder %s1957_s29, 1 }
   0x9   : > { %s2834_s10 = scalar_select %p184_p1, %s2743_s26, %s186_s8  }
   0xa   : > { %p2836_p5 = por %p197_p2, %p196_p0  ;;  %p2840_p6 = por %p203_p4, %p202_p3 }
   0xb   : > { %p1958_p7 = scmp.ge.s32.totalorder %s2747_s27, 1  ;;  %p210_p8 = scmp.lt.s32.totalorder %s2747_s27, 3 }
   0xc   : > { %s3487_s11 = scalar_select %p2836_p5, 1, 0 }
   0xd   : > { %s3488_s12 = scalar_select %p2840_p6, 1, 0 }
   0xe   : > { %p3481_p9 = scmp.eq.s32.totalorder %s2819_s28, 0  ;;  %p2847_p10 = pnand %p1958_p7, %p210_p8 }
   0xf   : > { %s2749_s14 = smov [#allocation3]   ;;  %s2653_s19 = scalar_lea.hbm %s3478_s5, 1024 }
  0x10   : > { %s3489_s13 = scalar_select %p2847_p10, 1, 0 }
  0x11   : > { %s234_s15 = sshll.u32 %s2749_s14, 4  ;;  %p2540_p11 = pneg %p2847_p10  ;;  %s235_s15 = int_to_ptr.vmem [resolvable:$true] %s234_s15 }
  0x12   : > { %p2654_p13 = scmp.ne.s32.totalorder %s3478_s5, %s2653_s19  ;;  %p2660_p3 = scmp.lt.u32.totalorder %s2653_s19, %s3478_s5 }
  0x13   : > { %p2855_p12 = pnand %p3481_p9, %p2540_p11 }
  0x15   : > { %p2655_p0 = pneg %p2855_p12 }
  0x17   : > { %p2656_p1 = pnand %p2655_p0, %p2654_p13 }
  0x19   : > { %p2657_p2 = pneg %p2656_p1 }
  0x1b   : > { %p2662_p4 = pnand %p2660_p3, %p2657_p2 }
  0x1d   : > { %2665 = shalt.err (!%p2662_p4)
}
  0x1e   : > { %s2666_s29 = scalar_lea.vmem %s235_s15, 1024  ;;  %p2674_p9 = scmp.lt.s32.totalorder %s235_s15, %s235_s15 }
  0x1f   : > { %p2667_p7 = scmp.ne.s32.totalorder %s235_s15, %s2666_s29  ;;  %p2675_p6 = scmp.lt.s32.totalorder %s2666_s29, %s2666_s29 }
  0x21   : > { %p2669_p8 = pnand %p2667_p7, %p2655_p0  ;;  %p2676_p5 = por %p2675_p6, %p2674_p9 }
  0x23   : > { %p2670_p11 = pneg %p2669_p8 }
  0x25   : > { %p2677_p10 = pnand %p2676_p5, %p2670_p11 }
  0x27   : > { %2680 = shalt.err (!%p2677_p10)
}
  0x28   : > { %s2750_s8 = smov 64   ;;  %s2751_s9 = smov 4  }
  0x29   : > { %2543 = dma.hbm_to_vmem [thread:$0]  (!%p2855_p12), %s3478_s5, 1024, %s235_s15, [#allocation4], %s2750_s8, %s2750_s8, %s2751_s9  }
  0x2a   : > { %p3491_p13 = scmp.ne.s32.totalorder %s3489_s13, 0 }
  0x2b   : > { %p3492_p1 = scmp.eq.s32.totalorder (!%p3491_p13), %s2819_s28, 0 }
  0x2c   : > { %258 = sbr.rel (%p3491_p13) target bundleno = 550 (0x226), region = 44 }
  0x33   : > { %2726 = dma.done.wait (%p3492_p1), [#allocation4], 1024   ;;  %p3493_p0 = pmov %p3492_p1 }
  0x34   : > { %p295_p5 = scmp.lt.s32.totalorder %s2819_s28, 1  ;;  %v2752_v0 = vmov 0   ;;  %v2753_v1 = vmov 0.0   ;;  %v377_v2 = vld [vmem:[%s3474_s1 + $0x10] sm:$0xff]  ;;  %v375_v3 = vld [vmem:[%s3474_s1] sm:$0xff]  ;;  %v378_v4 = vld [vmem:[%s3474_s1 + $0x18] sm:$0xff] }
  0x35   : > { %2728 = vsyncadd (%p3493_p0), [#allocation4], 4294966272  ;;  %2592 = vset.pattern.permute.xlu1 %v2752_v0  ;;  %2591 = vset.pattern.permute.xlu0 %v2752_v0  ;;  %v376_v5 = vld [vmem:[%s3474_s1 + $0x8] sm:$0xff]  ;;  %v379_v7 = vld [vmem:[%s3474_s1 + $0x20] sm:$0xff]  ;;  %vm2754_vm0 = vmmov 0   ;;  %vm3485_vm2 = vcmask 1040384  }
  0x36   : > { %s2883_s16 = scalar_select %p295_p5, %s2819_s28, 1  ;;  %2323 = vmatprep.subr.bf16.mxu0 %v2753_v1  ;;  %2287 = vmatprep.subr.bf16.mxu1 %v2753_v1  ;;  %v380_v6 = vld [vmem:[%s3474_s1 + $0x28] sm:$0xff]  ;;  %v2927_v8 = vld [vmem:[%s3477_s4] sm:$0xff]   ;;  %v382_v12 = vld [vmem:[%s3474_s1 + $0x38] sm:$0xff]  ;;  %vm3486_vm1 = vsmask.f32 256 }
  0x37   : > { %398 = vperm.xlu1 %2592, %v377_v2   ;;  %388 = vperm.xlu0 %2591, %v375_v3   ;;  %v2932_v9 = vld [vmem:[%s3477_s4 + $0x8] sm:$0xff]   ;;  %v2595_v10 = vld [vmem:[%s3477_s4 + $0x40] sm:$0xff]   ;;  %v381_v13 = vld [vmem:[%s3474_s1 + $0x30] sm:$0xff]  ;;  %vm591_vm3 = vsmask.f32 7424  ;;  %vm1155_vm5 = vcmask 1046528  }
  0x38   : > { %s2533_s13 = smul.u32 52, %s2883_s16  ;;  %2324 = vmatpush3.bf16.msra.mxu0 %v2927_v8  ;;  %2288 = vmatpush3.bf16.msra.mxu1 %v2595_v10  ;;  %v2597_v11 = vld [vmem:[%s3477_s4 + $0x48] sm:$0xff]   ;;  %v2952_v14 = vld [vmem:[%s3477_s4 + $0x10] sm:$0xff]   ;;  %v383_v17 = vld [vmem:[%s3474_s1 + $0x40] sm:$0xff]  ;;  %vm1340_vm6 = vcmask 1043458   ;;  %vm1314_vm8 = vcmask 1043457  }
  0x39   : > { %2325 = vmatprep.subr.bf16.mxu0 %v2753_v1  ;;  %2289 = vmatprep.subr.bf16.mxu1 %v2753_v1  ;;  %v384_v15 = vld [vmem:[%s3474_s1 + $0x48] sm:$0xff]  ;;  %v2599_v16 = vld [vmem:[%s3477_s4 + $0x50] sm:$0xff]   ;;  %v2969_v18 = vld [vmem:[%s3477_s4 + $0x18] sm:$0xff]   ;;  %s2532_s9 = smul.u32 44, %s2883_s16  ;;  %vm1341_vm7 = vsmask.f32 7946 }
  0x3a   : > { %s2891_s19 = scalar_lea.vmem %s3479_s6, %s2533_s13  ;;  %v2601_v19 = vld [vmem:[%s3477_s4 + $0x58] sm:$0xff]   ;;  %v385_v20 = vld [vmem:[%s3474_s1 + $0x50] sm:$0x1]  ;;  %v2982_v21 = vld [vmem:[%s3477_s4 + $0x20] sm:$0xff]   ;;  %2339 = vmatprep.mubr.msk.bf16.mxu0 %vm2754_vm0, %v2753_v1  ;;  %2303 = vmatprep.mubr.msk.bf16.mxu1 %vm2754_vm0, %v2753_v1  ;;  %vm1315_vm9 = vsmask.f32 7942 }
  0x3b   : > { %513 = vst [vmem:[%s2891_s19] sm:$0xf] %v2752_v0  ;;  %525 = vst [vmem:[%s2891_s19 + $0x30] sm:$0x3] %v2752_v0  ;;  %403 = vperm.xlu1 %2592, %v378_v4   ;;  %393 = vperm.xlu0 %2591, %v376_v5   ;;  %v2603_v22 = vld [vmem:[%s3477_s4 + $0x60] sm:$0xff]   ;;  %v2995_v23 = vld [vmem:[%s3477_s4 + $0x28] sm:$0xff]   ;;  %s3035_s13 = scalar_lea.vmem %s3473_s0, %s2532_s9  ;;  %s292_s14 = sand.u32 1, %s2739_s25  }
  0x3c   : > { %514 = vst [vmem:[%s2891_s19 + $0x4] sm:$0xf] %v2752_v0  ;;  %515 = vst [vmem:[%s2891_s19 + $0x8] sm:$0xf] %v2752_v0  ;;  %2326 = vmatpush3.bf16.msra.mxu0 %v2932_v9  ;;  %2290 = vmatpush3.bf16.msra.mxu1 %v2597_v11  ;;  %v2605_v24 = vld [vmem:[%s3477_s4 + $0x68] sm:$0xff]   ;;  %v3010_v25 = vld [vmem:[%s3477_s4 + $0x30] sm:$0xff]  }
  0x3d   : > { %516 = vst [vmem:[%s2891_s19 + $0xc] sm:$0xf] %v2752_v0  ;;  %517 = vst [vmem:[%s2891_s19 + $0x10] sm:$0xf] %v2752_v0  ;;  %2327 = vmatprep.subr.bf16.mxu0 %v2753_v1  ;;  %2291 = vmatprep.subr.bf16.mxu1 %v2753_v1  ;;  %v2607_v26 = vld [vmem:[%s3477_s4 + $0x70] sm:$0xff]   ;;  %v3019_v27 = vld [vmem:[%s3477_s4 + $0x38] sm:$0xff]  }
  0x3e   : > { %518 = vst [vmem:[%s2891_s19 + $0x14] sm:$0xf] %v2752_v0  ;;  %519 = vst [vmem:[%s2891_s19 + $0x18] sm:$0xf] %v2752_v0  ;;  %v2610_v28 = vld [vmem:[%s3477_s4 + $0x78] sm:$0xff]   ;;  %v2214_v29 = vld [vmem:[%s3035_s13 + $0x8] sm:$0xff]  }
  0x3f   : > { %520 = vst [vmem:[%s2891_s19 + $0x1c] sm:$0xf] %v2752_v0  ;;  %521 = vst [vmem:[%s2891_s19 + $0x20] sm:$0xf] %v2752_v0  ;;  %413 = vperm.xlu1 %2592, %v380_v6   ;;  %408 = vperm.xlu0 %2591, %v379_v7   ;;  %v2170_v30 = vld [vmem:[%s3035_s13] sm:$0xff]   ;;  %v2215_v31 = vld [vmem:[%s3035_s13 + $0x10] sm:$0xff]   ;;  %v2175_v32 = vunpack.c.l.bf16 %v2214_v29  ;;  %v2176_v34 = vunpack.c.h.bf16 %v2214_v29 }
  0x40   : > { %522 = vst [vmem:[%s2891_s19 + $0x24] sm:$0xf] %v2752_v0  ;;  %523 = vst [vmem:[%s2891_s19 + $0x28] sm:$0xf] %v2752_v0  ;;  %2328 = vmatpush3.bf16.msra.mxu0 %v2952_v14  ;;  %2292 = vmatpush3.bf16.msra.mxu1 %v2599_v16  ;;  %v2171_v33 = vunpack.c.l.bf16 %v2170_v30  ;;  %v2172_v35 = vunpack.c.h.bf16 %v2170_v30  ;;  %v1966_v36 = vld [vmem:[%s3475_s2] ss:$0 sm:$0xff]  ;;  %v2180_v37 = vunpack.c.h.bf16 %v2215_v31  ;;  %v2179_v38 = vunpack.c.l.bf16 %v2215_v31 }
  0x41   : > { %524 = vst [vmem:[%s2891_s19 + $0x2c] sm:$0xf] %v2752_v0  ;;  %2329 = vmatprep.subr.bf16.mxu0 %v2753_v1  ;;  %2293 = vmatprep.subr.bf16.mxu1 %v2753_v1  ;;  %v2216_v39 = vld [vmem:[%s3035_s13 + $0x18] sm:$0xff]   ;;  %v337_v40 = vmul.f32 %v2175_v32, %v1966_v36  ;;  %v338_v42 = vmul.f32 %v2176_v34, %v1966_v36  ;;  %v1967_v44 = vld [vmem:[%s3476_s3] ss:$0 sm:$0xff]  ;;  %vm3060_vm4 = vmand %vm3485_vm2, %vm3486_vm1  ;;  %vm1320_vm10 = vcmask 1041408  }
  0x42   : > { %v335_v41 = vmul.f32 %v2171_v33, %v1966_v36  ;;  %v336_v43 = vmul.f32 %v2172_v35, %v1966_v36  ;;  %v340_v45 = vmul.f32 %v2180_v37, %v1966_v36  ;;  %v339_v46 = vmul.f32 %v2179_v38, %v1966_v36  ;;  %v2217_v53 = vld [vmem:[%s3035_s13 + $0x20] sm:$0xff]   ;;  %v316_v3 = vld [vmem:[%s3035_s13 + $0x28] sm:$0x1]  ;;  %vm3221_vm11 = vmand %vm1340_vm6, %vm1341_vm7  ;;  %s3233_s17 = sshll.u32 %s292_s14, 5  ;;  %s2168_s18 = sshll.u32 %s2819_s28, 9 }
  0x43   : > { %423 = vperm.xlu1 %2592, %v382_v12   ;;  %418 = vperm.xlu0 %2591, %v381_v13   ;;  %v2184_v47 = vunpack.c.h.bf16 %v2216_v39  ;;  %v2183_v48 = vunpack.c.l.bf16 %v2216_v39  ;;  %v355_v49 = vadd.f32 %v1967_v44, %v337_v40  ;;  %v356_v51 = vadd.f32 %v1967_v44, %v338_v42  ;;  %vm3226_vm13 = vmand %vm1314_vm8, %vm1315_vm9  ;;  %s3267_s13 = scalar_lea.vmem [#allocation6], %s3233_s17  ;;  %s3425_s20 = scalar_lea.hbm %s3480_s7, %s2168_s18 }
  0x44   : > { %2330 = vmatpush3.bf16.msra.mxu0 %v2969_v18  ;;  %2294 = vmatpush3.bf16.msra.mxu1 %v2601_v19  ;;  %v353_v50 = vadd.f32 %v1967_v44, %v335_v41  ;;  %v354_v52 = vadd.f32 %v1967_v44, %v336_v43  ;;  %v358_v54 = vadd.f32 %v1967_v44, %v340_v45  ;;  %v2188_v60 = vunpack.c.h.bf16 %v2217_v53  ;;  %s1858_s15 = sshll.u32 %s3267_s13, 4  ;;  %s3432_s21 = scalar_lea.sflag [#allocation5], %s292_s14  ;;  %s3420_s15 = int_to_ptr.vmem [resolvable:$true] %s1858_s15 }
  0x45   : > { %2331 = vmatprep.subr.bf16.mxu0 %v2753_v1  ;;  %2295 = vmatprep.subr.bf16.mxu1 %v2753_v1  ;;  %v357_v55 = vadd.f32 %v1967_v44, %v339_v46  ;;  %v342_v56 = vmul.f32 %v2184_v47, %v1966_v36  ;;  %v341_v59 = vmul.f32 %v2183_v48, %v1966_v36  ;;  %v2187_v61 = vunpack.c.l.bf16 %v2217_v53  ;;  %v2609_v47 = vld [vmem:[%s3477_s4 + $0x80] sm:$0xff]   ;;  %s2681_s28 = scalar_lea.vmem %s3420_s15, 512  ;;  %p3528_p9 = scmp.ne.s32.totalorder %s3487_s11, 0 }
  0x46   : > { %v366_v62 = vmax.f32 %v355_v49, 0.0  ;;  %v364_v63 = vmax.f32 %v353_v50, 0.0  ;;  %v367_v0 = vmax.f32 %v356_v51, 0.0  ;;  %v365_v2 = vmax.f32 %v354_v52, 0.0  ;;  %p2682_p6 = scmp.ne.s32.totalorder %s3420_s15, %s2681_s28  ;;  %s2755_s22 = smov [#allocation6]  }
  0x47   : > { %433 = vperm.xlu1 %2592, %v384_v15   ;;  %428 = vperm.xlu0 %2591, %v383_v17   ;;  %v369_v4 = vmax.f32 %v358_v54, 0.0  ;;  %v368_v5 = vmax.f32 %v357_v55, 0.0  ;;  %v360_v6 = vadd.f32 %v1967_v44, %v342_v56  ;;  %v359_v11 = vadd.f32 %v1967_v44, %v341_v59  ;;  %s2685_s23 = sshll.u32 %s2755_s22, 4  ;;  %s2686_s23 = int_to_ptr.vmem [resolvable:$false] %s2685_s23 }
  0x48   : > { %2332 = vmatpush3.bf16.msra.mxu0 %v2982_v21  ;;  %2296 = vmatpush3.bf16.msra.mxu1 %v2603_v22  ;;  %v344_v12 = vmul.f32 %v2188_v60, %v1966_v36  ;;  %v343_v13 = vmul.f32 %v2187_v61, %v1966_v36  ;;  %v327_v15 = vunpack.c.l.bf16 %v316_v3  ;;  %v510_v61 = vld [vmem:[#allocation2 + $0x28] sm:$0x1]  ;;  %vm3484_vm12 = vsmask.f32 1280  ;;  %p2683_p10 = pnand %p2682_p6, %p3528_p9  ;;  %s2687_s29 = scalar_lea.vmem %s2686_s23, 1024 }
  0x49   : > { %2333 = vmatprep.subr.bf16.mxu0 %v2753_v1  ;;  %2297 = vmatprep.subr.bf16.mxu1 %v2753_v1  ;;  %v371_v29 = vmax.f32 %v360_v6, 0.0  ;;  %v370_v30 = vmax.f32 %v359_v11, 0.0  ;;  %vm1332_vm14 = vcmask 1045508   ;;  %vm3239_vm15 = vmand %vm1320_vm10, %vm3484_vm12  ;;  %vm1346_vm6 = vcmask 1042432   ;;  %p2688_p2 = scmp.lt.s32.totalorder %s3420_s15, %s2686_s23  ;;  %p2689_p3 = scmp.lt.s32.totalorder %s2687_s29, %s2681_s28 }
  0x4a   : > { %v362_v31 = vadd.f32 %v1967_v44, %v344_v12  ;;  %v361_v34 = vadd.f32 %v1967_v44, %v343_v13  ;;  %v345_v35 = vmul.f32 %v1966_v36, %v327_v15  ;;  %v2616_v15 = vld [vmem:[%s3477_s4 + $0xa0] sm:$0xff]   ;;  %vm1347_vm7 = vsmask.f32 2304  ;;  %p2684_p12 = pneg %p2683_p10 }
  0x4b   : > { %438 = vperm.xlu0 %2591, %v385_v20   ;;  %vm1387_vm9 = vsmask.f32 3328  ;;  %vm1470_vm12 = vsmask.f32 4368  ;;  %p2690_p4 = por %p2689_p3, %p2688_p2 }
  0x4c   : > { %2334 = vmatpush3.bf16.msra.mxu0 %v2995_v23  ;;  %2298 = vmatpush3.bf16.msra.mxu1 %v2605_v24  ;;  %v373_v40 = vmax.f32 %v362_v31, 0.0  ;;  %v372_v43 = vmax.f32 %v361_v34, 0.0  ;;  %v363_v45 = vadd.f32 %v1967_v44, %v345_v35  ;;  %v2611_v44 = vld [vmem:[%s3477_s4 + $0x88] sm:$0xff]  }
  0x4d   : > { %2335 = vmatprep.subr.bf16.mxu0 %v2753_v1  ;;  %2299 = vmatprep.subr.bf16.mxu1 %v2753_v1  ;;  %p2691_p7 = pnand %p2690_p4, %p2684_p12 }
  0x4e   : > { %v374_v52 = vmax.f32 %v363_v45, 0.0 }
  0x50   : > { %2336 = vmatpush3.bf16.msra.mxu0 %v3010_v25  ;;  %2300 = vmatpush3.bf16.msra.mxu1 %v2607_v26 }
  0x51   : > { %2337 = vmatprep.subr.bf16.mxu0 %v2753_v1  ;;  %2301 = vmatprep.subr.bf16.mxu1 %v2753_v1 }
  0x54   : > { %2338 = vmatpush3.bf16.msra.mxu0 %v3019_v27  ;;  %2302 = vmatpush3.bf16.msra.mxu1 %v2610_v28 }
  0x55   : > { %2359 = vmatprep.subr.bf16.mxu0 %v2753_v1  ;;  %2467 = vmatprep.subr.bf16.mxu1 %v2753_v1 }
  0xb6   : > { %v399_v57 = vpop.permute.xlu1 %398  ;;  %v389_v58 = vpop.permute.xlu0 %388 }
  0xb7   : > { %v443_v16 = vmul.f32 %v399_v57, %v366_v62  ;;  %v441_v17 = vmul.f32 %v389_v58, %v364_v63 }
  0xba   : > { %v404_v7 = vpop.permute.xlu1 %403  ;;  %v394_v10 = vpop.permute.xlu0 %393 }
  0xbb   : > { %v444_v19 = vmul.f32 %v404_v7, %v367_v0  ;;  %v442_v20 = vmul.f32 %v394_v10, %v365_v2  ;;  %v2614_v10 = vld [vmem:[%s3477_s4 + $0x98] sm:$0xff]  }
  0xbd   : > { %v2197_v22 = vpack.c.bf16 %v444_v19, %v443_v16  ;;  %v2192_v24 = vpack.c.bf16 %v442_v20, %v441_v17 }
  0xbe   : > { %v414_v26 = vpop.permute.xlu1 %413  ;;  %v409_v28 = vpop.permute.xlu0 %408 }
  0xbf   : > { %2218 = vst [vmem:[#allocation2 + $0x8] sm:$0xff] %v2197_v22   ;;  %2193 = vst [vmem:[#allocation2] sm:$0xff] %v2192_v24   ;;  %v446_v32 = vmul.f32 %v414_v26, %v369_v4  ;;  %v445_v33 = vmul.f32 %v409_v28, %v368_v5  ;;  %v2613_v4 = vld [vmem:[%s3477_s4 + $0x90] sm:$0xff]  }
  0xc0   : > { %v2619_v28 = vld [vmem:[%s3477_s4 + $0xb0] sm:$0xff]  }
  0xc1   : > { %v2202_v37 = vpack.c.bf16 %v446_v32, %v445_v33 }
  0xc2   : > { %v424_v38 = vpop.permute.xlu1 %423  ;;  %v419_v39 = vpop.permute.xlu0 %418 }
  0xc3   : > { %2219 = vst [vmem:[#allocation2 + $0x10] sm:$0xff] %v2202_v37   ;;  %v448_v41 = vmul.f32 %v424_v38, %v371_v29  ;;  %v447_v42 = vmul.f32 %v419_v39, %v370_v30 }
  0xc5   : > { %v2207_v46 = vpack.c.bf16 %v448_v41, %v447_v42  ;;  %v2625_v42 = vld [vmem:[%s3477_s4 + $0xc0] sm:$0xff]  }
  0xc6   : > { %v434_v48 = vpop.permute.xlu1 %433  ;;  %v429_v49 = vpop.permute.xlu0 %428  ;;  %v2608_v50 = vld [vmem:[#allocation2] sm:$0xff]   ;;  %v2612_v53 = vld [vmem:[#allocation2 + $0x8] sm:$0xff]  }
  0xc7   : > { %2220 = vst [vmem:[#allocation2 + $0x18] sm:$0xff] %v2207_v46   ;;  %v450_v36 = vmul.f32 %v434_v48, %v373_v40  ;;  %v449_v51 = vmul.f32 %v429_v49, %v372_v43  ;;  %v595_v54 = vshll.u32 %v2608_v50, 16  ;;  %2340 = vmatmul.mubr.bf16.vlgmr.msra.gmra.mrb[0].mxu0 %v2608_v50  ;;  %v593_v56 = vshrl.u32 %v2608_v50, 16  ;;  %v2622_v19 = vld [vmem:[#allocation2 + $0x4] sm:$0xff]  }
  0xc8   : > { %2360 = vmatpush3.bf16.msra.mxu0 %v2609_v47  ;;  %v600_v57 = vshll.u32 %v2612_v53, 16  ;;  %2343 = vmatprep.mubr.msk.bf16.mxu0 %vm2754_vm0, %v2753_v1  ;;  %v604_v12 = vshrl.u32 %v2612_v53, 16  ;;  %v933_v29 = vshll.u32 %v2622_v19, 16  ;;  %v931_v37 = vshrl.u32 %v2622_v19, 16 }
  0xc9   : > { %v2212_v55 = vpack.c.bf16 %v450_v36, %v449_v51  ;;  %2361 = vmatprep.subr.bf16.mxu0 %v2753_v1  ;;  %v597_v59 = vrot.slane %v595_v54, 1 }
  0xca   : > { %v439_v58 = vpop.permute.xlu0 %438  ;;  %v2615_v60 = vld [vmem:[#allocation2 + $0x10] sm:$0xff]   ;;  %v602_v2 = vrot.slane %v600_v57, 1  ;;  %v935_v33 = vrot.slane %v933_v29, 1 }
  0xcb   : > { %2221 = vst [vmem:[#allocation2 + $0x20] sm:$0xff] %v2212_v55   ;;  %v451_v62 = vmul.f32 %v439_v58, %v374_v52  ;;  %v598_v0 = vor.u32 %v597_v59, %v593_v56  ;;  %v608_v6 = vshll.u32 %v2615_v60, 16  ;;  %v612_v20 = vshrl.u32 %v2615_v60, 16  ;;  %v2633_v56 = vld [vmem:[%s3477_s4 + $0xe0] sm:$0xff]   ;;  %v2629_v58 = vld [vmem:[#allocation3] sm:$0xff]  }
  0xcc   : > { %2362 = vmatpush3.bf16.msra.mxu0 %v2611_v44  ;;  %v936_v40 = vor.u32 %v935_v33, %v931_v37 }
  0xcd   : > { %v2138_v3 = vpack.c.bf16 %v451_v62, %v451_v62  ;;  %v603_v5 = vsel %vm591_vm3, %v598_v0, %v602_v2  ;;  %2363 = vmatprep.subr.bf16.mxu0 %v2753_v1  ;;  %v610_v13 = vrot.slane %v608_v6, 1  ;;  %v2631_v0 = vld [vmem:[#allocation3 + $0x8] sm:$0xff]  }
  0xce   : > { %2304 = vmatmul.mubr.bf16.vlgmr.msra.gmra.mrb[0].mxu1 %v603_v5  ;;  %v2618_v11 = vld [vmem:[#allocation2 + $0x18] sm:$0xff]  }
  0xcf   : > { %v511_v7 = vsel %vm3060_vm4, %v2138_v3, %v510_v61  ;;  %2475 = vmatpush3.bf16.msra.mxu1 %v2927_v8  ;;  %2344 = vmatmul.mubr.bf16.gmra.mrb[4].mxu0 %v2612_v53  ;;  %v606_v8 = vor.u32 %v604_v12, %v602_v2  ;;  %v616_v16 = vshll.u32 %v2618_v11, 16  ;;  %v614_v26 = vor.u32 %v612_v20, %v610_v13  ;;  %v2635_v61 = vld [vmem:[%s3477_s4 + $0xe8] sm:$0xff]   ;;  %v2637_v3 = vld [vmem:[%s3477_s4 + $0xf0] sm:$0xff]   ;;  %v2634_v5 = vld [vmem:[#allocation3 + $0x10] sm:$0xff]  }
  0xd0   : > { %512 = vst [vmem:[#allocation2 + $0x28] sm:$0x1] %v511_v7  ;;  %2364 = vmatpush3.bf16.msra.mxu0 %v2613_v4  ;;  %2468 = vmatprep.subr.bf16.mxu1 %v2753_v1  ;;  %v620_v34 = vshrl.u32 %v2618_v11, 16  ;;  %v2639_v6 = vld [vmem:[%s3477_s4 + $0xf8] sm:$0xff]   ;;  %v2636_v7 = vld [vmem:[#allocation3 + $0x18] sm:$0xff]   ;;  %v2642_v12 = vld [vmem:[#allocation2 + $0xc] sm:$0xff]  }
  0xd1   : > { %2365 = vmatprep.subr.bf16.mxu0 %v2753_v1  ;;  %2307 = vmatprep.mubr.msk.bf16.mxu1 %vm2754_vm0, %v2753_v1  ;;  %v611_v17 = vsel %vm591_vm3, %v606_v8, %v610_v13  ;;  %v618_v22 = vrot.slane %v616_v16, 1  ;;  %v2638_v13 = vld [vmem:[#allocation3 + $0x20] sm:$0xff]   ;;  %v2641_v8 = vld [vmem:[#allocation2 + $0x4] sm:$0xfe]   ;;  %v2640_v16 = vld [vmem:[#allocation3 + $0x28] sm:$0xff]  }
  0xd2   : > { %2347 = vmatprep.mubr.msk.bf16.mxu0 %vm2754_vm0, %v2753_v1  ;;  %v3096_v24 = vld [vmem:[#allocation2 + $0x20] ss:$0 sps:$4 sm:$0xff]   ;;  %v2632_v44 = vld [vmem:[#allocation2 + $0x24] ss:$0 sps:$4 sm:$0xff]   ;;  %v2645_v19 = vld [vmem:[#allocation2 + $0x14] sm:$0xff]  }
  0xd3   : > { %2476 = vmatpush3.bf16.msra.mxu1 %v2932_v9  ;;  %v2617_v9 = vld [vmem:[%s3477_s4 + $0xa8] sm:$0xff]   ;;  %v619_v30 = vsel %vm591_vm3, %v614_v26, %v618_v22  ;;  %v624_v31 = vshll.u32 %v3096_v24, 16  ;;  %v622_v39 = vor.u32 %v620_v34, %v618_v22  ;;  %v628_v46 = vshrl.u32 %v3096_v24, 16  ;;  %v2627_v49 = vld [vmem:[#allocation2 + $0x1c] sm:$0xff]  }
  0xd4   : > { %2366 = vmatpush3.bf16.msra.mxu0 %v2614_v10  ;;  %2469 = vmatprep.subr.bf16.mxu1 %v2753_v1  ;;  %v954_v52 = vshll.u32 %v2627_v49, 16  ;;  %v958_v59 = vshrl.u32 %v2627_v49, 16  ;;  %v966_v10 = vshrl.u32 %v2632_v44, 16  ;;  %v2643_v20 = vld [vmem:[#allocation3 + $0x30] sm:$0xff]   ;;  %v2647_v22 = vld [vmem:[#allocation2 + $0xc] sm:$0xff]  }
  0xd5   : > { %2367 = vmatprep.subr.bf16.mxu0 %v2753_v1  ;;  %v626_v35 = vrot.slane %v624_v31, 1  ;;  %v2646_v26 = vld [vmem:[#allocation2 + $0x4] sm:$0xfe]  }
  0xd6   : > { %2308 = vmatmul.mubr.bf16.gmra.mrb[4].mxu1 %v611_v17  ;;  %v956_v54 = vrot.slane %v954_v52, 1  ;;  %v1156_v17 = vrot.slane %v2641_v8, 1  ;;  %v1567_v31 = vrot.slane %v2646_v26, 1  ;;  %v1323_v26 = vld [vmem:[%s2891_s19 + $0x8] sm:$0x3] }
  0xd7   : > { %2348 = vmatmul.mubr.bf16.gmra.mrb[8].mxu0 %v2615_v60  ;;  %2477 = vmatpush3.bf16.msra.mxu1 %v2952_v14  ;;  %v2623_v14 = vld [vmem:[#allocation2 + $0xc] sm:$0xff]   ;;  %v627_v41 = vsel %vm591_vm3, %v622_v39, %v626_v35  ;;  %v630_v50 = vor.u32 %v628_v46, %v626_v35  ;;  %v962_v60 = vshll.u32 %v2632_v44, 16  ;;  %v2650_v37 = vld [vmem:[#allocation2 + $0x24] sm:$0x1f]  }
  0xd8   : > { %2368 = vmatpush3.bf16.msra.mxu0 %v2616_v15  ;;  %2311 = vmatprep.mubr.msk.bf16.mxu1 %vm2754_vm0, %v2753_v1  ;;  %v938_v32 = vshll.u32 %v2623_v14, 16  ;;  %v942_v47 = vshrl.u32 %v2623_v14, 16  ;;  %v960_v62 = vor.u32 %v958_v59, %v956_v54  ;;  %v1157_v15 = vrot.slane %v2642_v12, 1  ;;  %v2644_v14 = vld [vmem:[#allocation3 + $0x38] sm:$0xff]  }
  0xd9   : > { %2369 = vmatprep.subr.bf16.mxu0 %v2753_v1  ;;  %2470 = vmatprep.subr.bf16.mxu1 %v2753_v1  ;;  %v964_v2 = vrot.slane %v962_v60, 1  ;;  %v1163_v39 = vrot.slane %v2650_v37, 1  ;;  %v1343_v12 = vld [vmem:[%s2891_s19 + $0x8] sm:$0xc] }
  0xda   : > { %2351 = vmatprep.mubr.msk.bf16.mxu0 %vm2754_vm0, %v2753_v1  ;;  %v940_v38 = vrot.slane %v938_v32, 1 }
  0xdb   : > { %2478 = vmatpush3.bf16.msra.mxu1 %v2969_v18  ;;  %v2620_v18 = vld [vmem:[%s3477_s4 + $0xb8] sm:$0xff]   ;;  %v965_v4 = vsel %vm591_vm3, %v960_v62, %v964_v2 }
  0xdc   : > { %2370 = vmatpush3.bf16.msra.mxu0 %v2617_v9  ;;  %2471 = vmatprep.subr.bf16.mxu1 %v2753_v1  ;;  %v941_v43 = vsel %vm591_vm3, %v936_v40, %v940_v38  ;;  %v944_v36 = vor.u32 %v942_v47, %v940_v38  ;;  %v1158_v9 = vsel %vm1155_vm5, %v1156_v17, %v1157_v15  ;;  %v1317_v17 = vld [vmem:[%s2891_s19 + $0x4] sm:$0xe] }
  0xdd   : > { %2371 = vmatprep.subr.bf16.mxu0 %v2753_v1 }
  0xde   : > { %2312 = vmatmul.mubr.bf16.gmra.mrb[8].mxu1 %v619_v30  ;;  %v2648_v30 = vld [vmem:[#allocation2 + $0x1c] sm:$0xff]  }
  0xdf   : > { %2352 = vmatmul.mubr.bf16.gmra.mrb[12].mxu0 %v2618_v11  ;;  %2479 = vmatpush3.bf16.msra.mxu1 %v2982_v21  ;;  %v2624_v21 = vld [vmem:[#allocation2 + $0x14] sm:$0xff]   ;;  %v968_v11 = vor.u32 %v966_v10, %v964_v2  ;;  %v1161_v33 = vrot.slane %v2648_v30, 1 }
  0xe0   : > { %2372 = vmatpush3.bf16.msra.mxu0 %v2619_v28  ;;  %2315 = vmatprep.mubr.msk.bf16.mxu1 %vm2754_vm0, %v2753_v1  ;;  %v946_v45 = vshll.u32 %v2624_v21, 16  ;;  %v950_v53 = vshrl.u32 %v2624_v21, 16  ;;  %v1568_v28 = vrot.slane %v2647_v22, 1  ;;  %v2651_v21 = vld [vmem:[#allocation2 + $0x1c] sm:$0xff]  }
  0xe1   : > { %2373 = vmatprep.subr.bf16.mxu0 %v2753_v1  ;;  %2375 = vmatprep.mubr.msk.bf16.mxu0 %vm2754_vm0, %v2753_v1  ;;  %v1572_v40 = vrot.slane %v2651_v21, 1 }
  0xe2   : > { %2472 = vmatprep.subr.bf16.mxu1 %v2753_v1  ;;  %v948_v48 = vrot.slane %v946_v45, 1  ;;  %v1569_v32 = vsel %vm1155_vm5, %v1567_v31, %v1568_v28 }
  0xe3   : > { %2480 = vmatpush3.bf16.msra.mxu1 %v2995_v23  ;;  %v2626_v23 = vld [vmem:[%s3477_s4 + $0xc8] sm:$0xff]  }
  0xe4   : > { %2374 = vmatpush3.bf16.msra.mxu0 %v2620_v18  ;;  %2473 = vmatprep.subr.bf16.mxu1 %v2753_v1  ;;  %v949_v51 = vsel %vm591_vm3, %v944_v36, %v948_v48  ;;  %v952_v55 = vor.u32 %v950_v53, %v948_v48  ;;  %v2649_v18 = vld [vmem:[#allocation2 + $0x14] sm:$0xff]  }
  0xe5   : > { %2395 = vmatprep.subr.bf16.mxu0 %v2753_v1  ;;  %v1570_v34 = vrot.slane %v2649_v18, 1 }
  0xe6   : > { %2316 = vmatmul.mubr.bf16.gmra.mrb[12].mxu1 %v627_v41  ;;  %v957_v57 = vsel %vm591_vm3, %v952_v55, %v956_v54  ;;  %v1164_v41 = vsel %vm1155_vm5, %v1161_v33, %v1163_v39  ;;  %vm1381_vm3 = vsmask.f32 7950 }
  0xe7   : > { %2376 = vmatmul.mubr.bf16.vlgmr.msra.gmra.mrb[0].mxu0 %v941_v43  ;;  %2319 = vmatprep.mubr.msk.bf16.mxu1 %vm2754_vm0, %v2753_v1  ;;  %v1571_v38 = vsel %vm1155_vm5, %v1568_v28, %v1570_v34  ;;  %v2652_v43 = vld [vmem:[#allocation2 + $0x24] sm:$0x1f]  }
  0xe8   : > { %2379 = vmatprep.mubr.msk.bf16.mxu0 %vm2754_vm0, %v2753_v1  ;;  %2481 = vmatpush3.bf16.msra.mxu1 %v3010_v25  ;;  %v2628_v25 = vld [vmem:[%s3477_s4 + $0xd0] sm:$0xff]   ;;  %v1574_v45 = vrot.slane %v2652_v43, 1 }
  0xe9   : > { %2396 = vmatpush3.bf16.msra.mxu0 %v2625_v42  ;;  %2474 = vmatprep.subr.bf16.mxu1 %v2753_v1  ;;  %v1573_v42 = vsel %vm1155_vm5, %v1570_v34, %v1572_v40 }
  0xea   : > { %2397 = vmatprep.subr.bf16.mxu0 %v2753_v1 }
  0xec   : > { %2482 = vmatpush3.bf16.msra.mxu1 %v3019_v27  ;;  %v2630_v27 = vld [vmem:[%s3477_s4 + $0xd8] sm:$0xff]  }
  0xed   : > { %2398 = vmatpush3.bf16.msra.mxu0 %v2626_v23  ;;  %2431 = vmatprep.subr.bf16.mxu1 %v2753_v1  ;;  %v1575_v23 = vsel %vm1155_vm5, %v1572_v40, %v1574_v45 }
  0xee   : > { %2320 = vmatmul.mubr.bf16.gmra.mrb[16].mxu1 %v630_v50  ;;  %2399 = vmatprep.subr.bf16.mxu0 %v2753_v1 }
  0xef   : > { %2380 = vmatmul.mubr.bf16.gmra.mrb[4].mxu0 %v949_v51  ;;  %2355 = vmatprep.mubr.msk.bf16.mxu1 %vm2754_vm0, %v2753_v1 }
  0xf0   : > { %2383 = vmatprep.mubr.msk.bf16.mxu0 %vm2754_vm0, %v2753_v1 }
  0xf1   : > { %2400 = vmatpush3.bf16.msra.mxu0 %v2628_v25 }
  0xf2   : > { %2401 = vmatprep.subr.bf16.mxu0 %v2753_v1 }
  0xf5   : > { %2402 = vmatpush3.bf16.msra.mxu0 %v2630_v27 }
  0xf6   : > { %2403 = vmatprep.subr.bf16.mxu0 %v2753_v1 }
  0xf7   : > { %2384 = vmatmul.mubr.bf16.gmra.mrb[8].mxu0 %v957_v57 }
  0xf8   : > { %2387 = vmatprep.mubr.msk.bf16.mxu0 %vm2754_vm0, %v2753_v1 }
  0xf9   : > { %2404 = vmatpush3.bf16.msra.mxu0 %v2633_v56 }
  0xfa   : > { %2356 = vmatmul.mubr.bf16.vlgmr.msra.gmra.mrb[16].mxu1 %v3096_v24  ;;  %2405 = vmatprep.subr.bf16.mxu0 %v2753_v1  ;;  %v1159_v24 = vrot.slane %v2645_v19, 1 }
  0xfb   : > { %2432 = vmatpush3.bf16.msra.mxu1 %v2629_v58  ;;  %2447 = vmatprep.mubr.msk.bf16.mxu1 %vm2754_vm0, %v2753_v1 }
  0xfc   : > { %2433 = vmatprep.subr.bf16.mxu1 %v2753_v1  ;;  %v1160_v29 = vsel %vm1155_vm5, %v1157_v15, %v1159_v24  ;;  %v1162_v35 = vsel %vm1155_vm5, %v1159_v24, %v1161_v33  ;;  %vm3250_vm5 = vmor %vm1320_vm10, %vm1332_vm14  ;;  %vm1421_vm10 = vsmask.f32 7440 }
  0xfd   : > { %2406 = vmatpush3.bf16.msra.mxu0 %v2635_v61  ;;  %vm3274_vm14 = vmand %vm1346_vm6, %vm1347_vm7 }
  0xfe   : > { %2407 = vmatprep.subr.bf16.mxu0 %v2753_v1  ;;  %vm3297_vm1 = vmor %vm1387_vm9, %vm1421_vm10 }
  0xff   : > { %2434 = vmatpush3.bf16.msra.mxu1 %v2631_v0  ;;  %2388 = vmatmul.mubr.bf16.gmra.mrb[12].mxu0 %v965_v4 }
 0x100   : > { %2435 = vmatprep.subr.bf16.mxu1 %v2753_v1  ;;  %2391 = vmatprep.mubr.msk.bf16.mxu0 %vm2754_vm0, %v2753_v1 }
 0x101   : > { %2408 = vmatpush3.bf16.msra.mxu0 %v2637_v3 }
 0x102   : > { %2409 = vmatprep.subr.bf16.mxu0 %v2753_v1 }
 0x103   : > { %2436 = vmatpush3.bf16.msra.mxu1 %v2634_v5 }
 0x104   : > { %2437 = vmatprep.subr.bf16.mxu1 %v2753_v1 }
 0x105   : > { %2410 = vmatpush3.bf16.msra.mxu0 %v2639_v6 }
 0x107   : > { %2438 = vmatpush3.bf16.msra.mxu1 %v2636_v7  ;;  %2392 = vmatmul.mubr.bf16.gmra.mrb[16].mxu0 %v968_v11 }
 0x108   : > { %2439 = vmatprep.subr.bf16.mxu1 %v2753_v1  ;;  %2411 = vmatprep.mubr.msk.bf16.mxu0 %vm2754_vm0, %v2753_v1 }
 0x10b   : > { %2440 = vmatpush3.bf16.msra.mxu1 %v2638_v13 }
 0x10c   : > { %2441 = vmatprep.subr.bf16.mxu1 %v2753_v1 }
 0x10f   : > { %2442 = vmatpush3.bf16.msra.mxu1 %v2640_v16  ;;  %2412 = vmatmul.mubr.bf16.vlgmr.msra.gmra.mrb[0].mxu0 %v1158_v9 }
 0x110   : > { %2443 = vmatprep.subr.bf16.mxu1 %v2753_v1  ;;  %2415 = vmatprep.mubr.msk.bf16.mxu0 %vm2754_vm0, %v2753_v1 }
 0x113   : > { %2444 = vmatpush3.bf16.msra.mxu1 %v2643_v20 }
 0x114   : > { %2445 = vmatprep.subr.bf16.mxu1 %v2753_v1 }
 0x117   : > { %2446 = vmatpush3.bf16.msra.mxu1 %v2644_v14  ;;  %2416 = vmatmul.mubr.bf16.gmra.mrb[4].mxu0 %v1160_v29 }
 0x118   : > { %2419 = vmatprep.mubr.msk.bf16.mxu0 %vm2754_vm0, %v2753_v1 }
 0x11a   : > { %2448 = vmatmul.mubr.bf16.vlgmr.msra.gmra.mrb[20].mxu1 %v1569_v32 }
 0x11b   : > { %2451 = vmatprep.mubr.msk.bf16.mxu1 %vm2754_vm0, %v2753_v1 }
 0x11f   : > { %2420 = vmatmul.mubr.bf16.gmra.mrb[8].mxu0 %v1162_v35 }
 0x120   : > { %2423 = vmatprep.mubr.msk.bf16.mxu0 %vm2754_vm0, %v2753_v1 }
 0x122   : > { %2452 = vmatmul.mubr.bf16.gmra.mrb[24].mxu1 %v1571_v38 }
 0x123   : > { %2455 = vmatprep.mubr.msk.bf16.mxu1 %vm2754_vm0, %v2753_v1 }
 0x127   : > { %2424 = vmatmul.mubr.bf16.gmra.mrb[12].mxu0 %v1164_v41 }
 0x128   : > { %2427 = vmatprep.mubr.msk.bf16.mxu0 %vm2754_vm0, %v2753_v1 }
 0x12a   : > { %2456 = vmatmul.mubr.bf16.gmra.mrb[28].mxu1 %v1573_v42 }
 0x12b   : > { %2459 = vmatprep.mubr.msk.bf16.mxu1 %vm2754_vm0, %v2753_v1 }
 0x12f   : > { %2428 = vmatmul.mubr.bf16.gmra.mrb[16].mxu0 %v1163_v39 }
 0x132   : > { %2460 = vmatmul.mubr.bf16.gmra.mrb[32].mxu1 %v1575_v23 }
 0x133   : > { %2463 = vmatprep.mubr.msk.bf16.mxu1 %vm2754_vm0, %v2753_v1  ;;  %vm1380_vm0 = vcmask 1043459  }
 0x134   : > { %vm3259_vm8 = vmand %vm1380_vm0, %vm1381_vm3  ;;  %vm1358_vm0 = vsmask.f32 6416  ;;  %vm1398_vm3 = vcmask 1046532  }
 0x135   : > { %vm3305_vm2 = vmor %vm1347_vm7, %vm1358_vm0 }
 0x13a   : > { %2464 = vmatmul.mubr.bf16.gmra.mrb[36].mxu1 %v1574_v45  ;;  %v1383_v45 = vld [vmem:[%s2891_s19 + $0xc] sm:$0x8] }
 0x1a1   : > { %v718_v46 = vpop.f32.mrb[0].mxu1 }
 0x1a2   : > { %v2305_v47 = vpop.f32.mrb[1].mxu1 }
 0x1a3   : > { %v721_v48 = vpop.f32.mrb[2].mxu1 }
 0x1a4   : > { %v2306_v49 = vpop.f32.mrb[3].mxu1 }
 0x1a9   : > { %v726_v50 = vpop.f32.mrb[4].mxu1 }
 0x1aa   : > { %v2309_v36 = vpop.f32.mrb[5].mxu1 }
 0x1ab   : > { %v729_v25 = vpop.f32.mrb[6].mxu1  ;;  %v1389_v36 = vld [vmem:[%s2891_s19 + $0x10] sm:$0xf] }
 0x1ac   : > { %v2310_v51 = vpop.f32.mrb[7].mxu1 }
 0x1b1   : > { %v3210_v52 = vpop.f32.mrb[8].mxu1 }
 0x1b2   : > { %v2313_v27 = vpop.f32.mrb[9].mxu1 }
 0x1b3   : > { %v3212_v53 = vpop.f32.mrb[10].mxu1 }
 0x1b4   : > { %v2314_v54 = vpop.f32.mrb[11].mxu1 }
 0x1b9   : > { %v3214_v55 = vpop.f32.mrb[12].mxu1 }
 0x1ba   : > { %v2317_v44 = vpop.f32.mrb[13].mxu1 }
 0x1bb   : > { %v3216_v56 = vpop.f32.mrb[14].mxu1 }
 0x1bc   : > { %v2318_v1 = vpop.f32.mrb[15].mxu1 }
 0x1cd   : > { %v3218_v57 = vpop.f32.mrb[16].mxu1 }
 0x1ce   : > { %v2357_v58 = vpop.f32.mrb[17].mxu1 }
 0x1cf   : > { %v878_v59 = vpop.f32.mrb[18].mxu1 }
 0x1d0   : > { %v2358_v60 = vpop.f32.mrb[19].mxu1 }
 0x1e2   : > { %v1252_v61 = vpop.f32.mrb[0].mxu0 }
 0x1e3   : > { %v2483_v62 = vadd.f32 %v1252_v61, %v718_v46  ;;  %v2413_v0 = vpop.f32.mrb[1].mxu0 }
 0x1e4   : > { %v1255_v2 = vpop.f32.mrb[2].mxu0 }
 0x1e5   : > { %v2139_v3 = vpack.c.bf16 %v2483_v62, %v2483_v62  ;;  %v2484_v4 = vadd.f32 %v1255_v2, %v721_v48  ;;  %v2414_v5 = vpop.f32.mrb[3].mxu0 }
 0x1e7   : > { %v1304_v6 = vshrl.u32 %v2139_v3, 16  ;;  %v1307_v7 = vshll.u32 %v2139_v3, 16  ;;  %v2140_v10 = vpack.c.bf16 %v2484_v4, %v2484_v4 }
 0x1e9   : > { %v1306_v13 = vrot.slane %v1304_v6, 6  ;;  %v1309_v8 = vrot.slane %v1307_v7, 7  ;;  %v1334_v15 = vrot.slane %v2140_v10, 6 }
 0x1ea   : > { %v1260_v9 = vpop.f32.mrb[4].mxu0 }
 0x1eb   : > { %v1310_v19 = vor.u32 %v1309_v8, %v1306_v13  ;;  %v1344_v20 = vsel %vm3221_vm11, %v1334_v15, %v1343_v12  ;;  %v2485_v22 = vadd.f32 %v1260_v9, %v726_v50  ;;  %v2417_v24 = vpop.f32.mrb[5].mxu0  ;;  %v1335_v34 = vrot.slane %v1334_v15, 4 }
 0x1ec   : > { %1345 = vst [vmem:[%s2891_s19 + $0x8] sm:$0xc] %v1344_v20  ;;  %v1263_v28 = vpop.f32.mrb[6].mxu0  ;;  %v1458_v24 = vld [vmem:[%s2891_s19 + $0x1c] sm:$0xc] }
 0x1ed   : > { %v1311_v29 = vrot.slane %v1310_v19, 4  ;;  %v1318_v30 = vsel %vm3226_vm13, %v1310_v19, %v1317_v17  ;;  %v2141_v31 = vpack.c.bf16 %v2485_v22, %v2485_v22  ;;  %v2486_v32 = vadd.f32 %v1263_v28, %v729_v25  ;;  %v1663_v18 = vpop.f32.mrb[20].mxu1  ;;  %v2418_v33 = vpop.f32.mrb[7].mxu0  ;;  %v1349_v25 = vld [vmem:[%s2891_s19 + $0xc] sm:$0x7] }
 0x1ee   : > { %1319 = vst [vmem:[%s2891_s19 + $0x4] sm:$0xe] %v1318_v30  ;;  %v1701_v37 = vpack.c.bf16 %v1663_v18, %v1663_v18  ;;  %v2449_v38 = vpop.f32.mrb[21].mxu1 }
 0x1ef   : > { %v1324_v21 = vsel %vm3239_vm15, %v1311_v29, %v1323_v26  ;;  %v1336_v39 = vrot.slane %v2141_v31, 6  ;;  %v1361_v40 = vshll.u32 %v2141_v31, 16  ;;  %v1364_v41 = vshrl.u32 %v2141_v31, 16  ;;  %v1666_v42 = vpop.f32.mrb[22].mxu1 }
 0x1f0   : > { %1325 = vst [vmem:[%s2891_s19 + $0x8] sm:$0x3] %v1324_v21  ;;  %v3264_v23 = vpack.c.bf16 %v2486_v32, %v2486_v32  ;;  %1702 = vst [vmem:[%s3267_s13] sm:$0xf] %v1701_v37  ;;  %v2154_v46 = vpack.c.bf16 %v1666_v42, %v1666_v42  ;;  %v2450_v47 = vpop.f32.mrb[23].mxu1 }
 0x1f1   : > { %v1337_v48 = vsel %vm3250_vm5, %v1335_v34, %v1336_v39  ;;  %v1363_v49 = vrot.slane %v1361_v40, 6  ;;  %v1366_v50 = vrot.slane %v1364_v41, 5 }
 0x1f2   : > { %v1370_v51 = vshrl.u32 %v3264_v23, 16  ;;  %v1373_v27 = vshll.u32 %v3264_v23, 16  ;;  %v1710_v54 = vshrl.u32 %v2154_v46, 16  ;;  %v1268_v44 = vpop.f32.mrb[8].mxu0  ;;  %v1713_v59 = vshll.u32 %v2154_v46, 16 }
 0x1f3   : > { %v1367_v1 = vor.u32 %v1366_v50, %v1363_v49  ;;  %v1384_v58 = vsel %vm3259_vm8, %v1363_v49, %v1383_v45  ;;  %v2487_v60 = vadd.f32 %v1268_v44, %v3210_v52  ;;  %v2421_v61 = vpop.f32.mrb[9].mxu0  ;;  %v1350_v4 = vsel %vm3274_vm14, %v1337_v48, %v1349_v25 }
 0x1f4   : > { %1385 = vst [vmem:[%s2891_s19 + $0xc] sm:$0x8] %v1384_v58  ;;  %v3285_v62 = vrot.slane %v1370_v51, 5  ;;  %v1375_v0 = vrot.slane %v1373_v27, 6  ;;  %v1712_v2 = vrot.slane %v1710_v54, 4  ;;  %v1271_v3 = vpop.f32.mrb[10].mxu0 }
 0x1f5   : > { %v1715_v5 = vrot.slane %v1713_v59, 5  ;;  %v2145_v6 = vpack.c.bf16 %v2487_v60, %v2487_v60  ;;  %v2488_v7 = vadd.f32 %v1271_v3, %v3212_v53  ;;  %v1671_v10 = vpop.f32.mrb[24].mxu1  ;;  %v2422_v12 = vpop.f32.mrb[11].mxu0  ;;  %1351 = vst [vmem:[%s2891_s19 + $0xc] sm:$0x7] %v1350_v4  ;;  %v1368_v52 = vrot.slane %v1367_v1, 4 }
 0x1f6   : > { %v1376_v13 = vor.u32 %v1375_v0, %v3285_v62  ;;  %v2081_v8 = vrot.slane %v3264_v23, 9  ;;  %v2155_v15 = vpack.c.bf16 %v1671_v10, %v1671_v10  ;;  %v2453_v17 = vpop.f32.mrb[25].mxu1  ;;  %v1412_v53 = vld [vmem:[%s2891_s19 + $0x18] sm:$0x1]  ;;  %v1444_v1 = vld [vmem:[%s2891_s19 + $0x18] sm:$0xe] }
 0x1f7   : > { %v1716_v9 = vor.u32 %v1715_v5, %v1712_v2  ;;  %v1402_v19 = vrot.slane %v2145_v6, 5  ;;  %v1424_v20 = vshrl.u32 %v2145_v6, 16  ;;  %v1427_v22 = vshll.u32 %v2145_v6, 16  ;;  %v1674_v26 = vpop.f32.mrb[26].mxu1  ;;  %v1461_v4 = vld [vmem:[%s2891_s19 + $0x20] sm:$0x7] }
 0x1f8   : > { %v2147_v28 = vpack.c.bf16 %v2488_v7, %v2488_v7  ;;  %v1719_v29 = vshll.u32 %v2155_v15, 16  ;;  %v2109_v30 = vrot.slane %v2155_v15, 9  ;;  %v2157_v31 = vpack.c.bf16 %v1674_v26, %v1674_v26  ;;  %v2454_v32 = vpop.f32.mrb[27].mxu1  ;;  %v1447_v7 = vld [vmem:[%s2891_s19 + $0x1c] sm:$0x3] }
 0x1f9   : > { %v1717_v18 = vrot.slane %v1716_v9, 4  ;;  %v1404_v33 = vrot.slane %v1402_v19, 4  ;;  %v1426_v34 = vrot.slane %v1424_v20, 4  ;;  %v1429_v37 = vrot.slane %v1427_v22, 5  ;;  %v1489_v9 = vld [vmem:[%s2891_s19 + $0x20] sm:$0x8] }
 0x1fa   : > { %v1433_v21 = vshll.u32 %v2147_v28, 16  ;;  %v1437_v39 = vshrl.u32 %v2147_v28, 16  ;;  %v1459_v40 = vsel %vm3221_vm11, %v2147_v28, %v1458_v24  ;;  %v1721_v41 = vrot.slane %v1719_v29, 5  ;;  %v1276_v42 = vpop.f32.mrb[12].mxu0  ;;  %vm3314_vm11 = vmor %vm1346_vm6, %vm1398_vm3 }
 0x1fb   : > { %v1413_v23 = vsel %vm3060_vm4, %v1404_v33, %v1412_v53  ;;  %v1430_v46 = vor.u32 %v1429_v37, %v1426_v34  ;;  %1460 = vst [vmem:[%s2891_s19 + $0x1c] sm:$0xc] %v1459_v40  ;;  %v1733_v47 = vrot.slane %v2157_v31, 5  ;;  %v1744_v48 = vshrl.u32 %v2157_v31, 16  ;;  %v2425_v49 = vpop.f32.mrb[13].mxu0 }
 0x1fc   : > { %1414 = vst [vmem:[%s2891_s19 + $0x18] sm:$0x1] %v1413_v23  ;;  %v1435_v50 = vrot.slane %v1433_v21, 5  ;;  %v1439_v25 = vrot.slane %v1437_v39, 4  ;;  %v1722_v51 = vsel %vm3297_vm1, %v1717_v18, %v1721_v41  ;;  %v1747_v27 = vshll.u32 %v2157_v31, 16  ;;  %v1279_v54 = vpop.f32.mrb[14].mxu0 }
 0x1fd   : > { %v1431_v44 = vrot.slane %v1430_v46, 4  ;;  %1724 = vst [vmem:[%s3267_s13 + $0x4] sm:$0xf] %v1722_v51  ;;  %v1746_v58 = vrot.slane %v1744_v48, 5  ;;  %v2489_v59 = vadd.f32 %v1276_v42, %v3214_v55  ;;  %v3326_v60 = vsel %vm3305_vm2, %v1368_v52, %v1376_v13  ;;  %v1679_v61 = vpop.f32.mrb[28].mxu1  ;;  %v2426_v62 = vpop.f32.mrb[15].mxu0 }
 0x1fe   : > { %v1440_v0 = vor.u32 %v1439_v25, %v1435_v50  ;;  %v1749_v2 = vrot.slane %v1747_v27, 6  ;;  %v1403_v3 = vsel %vm3314_vm11, %v2081_v8, %v1402_v19  ;;  %v1734_v5 = vsel %vm3314_vm11, %v2109_v30, %v1733_v47  ;;  %v2457_v6 = vpop.f32.mrb[29].mxu1  ;;  %v1409_v34 = vld [vmem:[%s2891_s19 + $0x14] sm:$0xf] }
 0x1ff   : > { %v1436_v55 = vsel %vm3297_vm1, %v1431_v44, %v1435_v50  ;;  %v2149_v10 = vpack.c.bf16 %v2489_v59, %v2489_v59  ;;  %1736 = vst [vmem:[%s3267_s13 + $0x8] sm:$0xf] %v1734_v5  ;;  %v2490_v12 = vadd.f32 %v1279_v54, %v3216_v56  ;;  %v2159_v52 = vpack.c.bf16 %v1679_v61, %v1679_v61  ;;  %v1682_v13 = vpop.f32.mrb[30].mxu1  ;;  %v1492_v59 = vld [vmem:[%s2891_s19 + $0x24] sm:$0xf] }
 0x200   : > { %v1441_v15 = vrot.slane %v1440_v0, 4  ;;  %v1445_v8 = vsel %vm3226_vm13, %v1436_v55, %v1444_v1  ;;  %v1750_v17 = vor.u32 %v1749_v2, %v1746_v58  ;;  %v2161_v19 = vpack.c.bf16 %v1682_v13, %v1682_v13  ;;  %v2458_v20 = vpop.f32.mrb[31].mxu1 }
 0x201   : > { %1446 = vst [vmem:[%s2891_s19 + $0x18] sm:$0xe] %v1445_v8  ;;  %v1462_v22 = vsel %vm3274_vm14, %v2149_v10, %v1461_v4  ;;  %v1473_v24 = vshll.u32 %v2149_v10, 16  ;;  %v1475_v26 = vshrl.u32 %v2149_v10, 16  ;;  %v3344_v56 = vpack.c.bf16 %v2490_v12, %v2490_v12  ;;  %v1513_v12 = vld [vmem:[%s2891_s19 + $0x2c] sm:$0x1] }
 0x202   : > { %v1448_v53 = vsel %vm3239_vm15, %v1441_v15, %v1447_v7  ;;  %1463 = vst [vmem:[%s2891_s19 + $0x20] sm:$0x7] %v1462_v22  ;;  %v1753_v16 = vshrl.u32 %v2159_v52, 16  ;;  %v1756_v28 = vshll.u32 %v2159_v52, 16  ;;  %v1284_v29 = vpop.f32.mrb[16].mxu0  ;;  %vm3514_vm1 = vcmask 1043456  }
 0x203   : > { %vm3351_vm13 = vmand %vm3514_vm1, %vm1387_vm9  ;;  %vm1501_vm6 = vcmask 1044484   ;;  %1449 = vst [vmem:[%s2891_s19 + $0x1c] sm:$0x3] %v1448_v53  ;;  %v1751_v31 = vrot.slane %v1750_v17, 4  ;;  %v2088_v32 = vrot.slane %v1475_v26, 11  ;;  %v1490_v14 = vsel %vm3259_vm8, %v1473_v24, %v1489_v9  ;;  %v2429_v37 = vpop.f32.mrb[17].mxu0 }
 0x204   : > { %v1480_v18 = vshrl.u32 %v3344_v56, 16  ;;  %vm3517_vm15 = vsmask.f32 7938  ;;  %vm3518_vm7 = vmmov %vm3514_vm1  ;;  %1491 = vst [vmem:[%s2891_s19 + $0x20] sm:$0x8] %v1490_v14  ;;  %v1483_v38 = vshll.u32 %v3344_v56, 16  ;;  %v2491_v50 = vadd.f32 %v1284_v29, %v3218_v57 }
 0x205   : > { %vm3362_vm10 = vmand %vm3518_vm7, %vm3517_vm15  ;;  %v1755_v21 = vrot.slane %v1753_v16, 5  ;;  %v1758_v39 = vrot.slane %v1756_v28, 6  ;;  %v2114_v40 = vrot.slane %v2159_v52, 10  ;;  %v1287_v41 = vpop.f32.mrb[18].mxu0  ;;  %v1771_v43 = vrot.slane %v2161_v19, 6  ;;  %v1687_v47 = vpop.f32.mrb[32].mxu1 }
 0x206   : > { %v1482_v42 = vrot.slane %v1480_v18, 7  ;;  %v1784_v23 = vshrl.u32 %v2161_v19, 16  ;;  %v1787_v46 = vshll.u32 %v2161_v19, 16  ;;  %v2430_v48 = vpop.f32.mrb[19].mxu0  ;;  %vm3521_vm8 = vsmask.f32 256 }
 0x207   : > { %vm3371_vm9 = vmor %vm3521_vm8, %vm1470_vm12  ;;  %v1759_v49 = vor.u32 %v1758_v39, %v1755_v21  ;;  %v1390_v25 = vsel %vm3351_vm13, %v3326_v60, %v1389_v36  ;;  %v1410_v51 = vsel %vm3362_vm10, %v1403_v3, %v1409_v34  ;;  %v2461_v27 = vpop.f32.mrb[33].mxu1  ;;  %v1772_v44 = vsel %vm3250_vm5, %v2114_v40, %v1771_v43  ;;  %v1510_v7 = vld [vmem:[%s2891_s19 + $0x28] sm:$0xf] }
 0x208   : > { %v1485_v54 = vor.u32 %v1483_v38, %v1482_v42  ;;  %v1786_v1 = vrot.slane %v1784_v23, 6  ;;  %v1789_v58 = vrot.slane %v1787_v46, 7  ;;  %1391 = vst [vmem:[%s2891_s19 + $0x10] sm:$0xf] %v1390_v25  ;;  %1411 = vst [vmem:[%s2891_s19 + $0x14] sm:$0xf] %v1410_v51  ;;  %v2153_v60 = vpack.c.bf16 %v2491_v50, %v2491_v50 }
 0x209   : > { %v1690_v57 = vpop.f32.mrb[34].mxu1  ;;  %v1760_v61 = vsel %vm3305_vm2, %v1751_v31, %v1759_v49  ;;  %1774 = vst [vmem:[%s3267_s13 + $0x10] sm:$0xf] %v1772_v44  ;;  %v2163_v62 = vpack.c.bf16 %v1687_v47, %v1687_v47  ;;  %v2091_v3 = vrot.slane %v3344_v56, 11  ;;  %vm3524_vm12 = vcmask 1040384  }
 0x20a   : > { %v2165_v0 = vpack.c.bf16 %v1690_v57, %v1690_v57  ;;  %v2462_v2 = vpop.f32.mrb[35].mxu1  ;;  %v1486_v35 = vsel %vm3371_vm9, %v2088_v32, %v1485_v54  ;;  %1762 = vst [vmem:[%s3267_s13 + $0xc] sm:$0xf] %v1760_v61  ;;  %v1790_v4 = vor.u32 %v1789_v58, %v1786_v1  ;;  %vm3395_vm5 = vmor %vm3524_vm12, %vm1501_vm6  ;;  %vm1781_vm2 = vsmask.f32 5392 }
 0x20b   : > { %v1493_v45 = vsel %vm3351_vm13, %v1486_v35, %v1492_v59  ;;  %v1505_v6 = vrot.slane %v2153_v60, 7  ;;  %v1793_v55 = vshrl.u32 %v2163_v62, 16  ;;  %v1796_v10 = vshll.u32 %v2163_v62, 16 }
 0x20c   : > { %1494 = vst [vmem:[%s2891_s19 + $0x24] sm:$0xf] %v1493_v45  ;;  %v2119_v52 = vrot.slane %v2163_v62, 11  ;;  %v1811_v13 = vrot.slane %v2165_v0, 7  ;;  %vm3527_vm14 = vsmask.f32 1280 }
 0x20d   : > { %v1506_v15 = vsel %vm3395_vm5, %v2091_v3, %v1505_v6  ;;  %v1507_v8 = vrot.slane %v1505_v6, 4  ;;  %v1795_v17 = vrot.slane %v1793_v55, 6  ;;  %v1798_v9 = vrot.slane %v1796_v10, 7  ;;  %vm1782_vm0 = vmor %vm3527_vm14, %vm1781_vm2  ;;  %v1695_v22 = vpop.f32.mrb[36].mxu1 }
 0x20e   : > { %v1511_v19 = vsel %vm3362_vm10, %v1506_v15, %v1510_v7  ;;  %v1812_v20 = vsel %vm3395_vm5, %v2119_v52, %v1811_v13  ;;  %v1791_v24 = vrot.slane %v1790_v4, 4  ;;  %v2167_v53 = vpack.c.bf16 %v1695_v22, %v1695_v22  ;;  %v2465_v16 = vpop.f32.mrb[37].mxu1 }
 0x20f   : > { %1512 = vst [vmem:[%s2891_s19 + $0x28] sm:$0xf] %v1511_v19  ;;  %v1514_v26 = vsel %vm3060_vm4, %v1507_v8, %v1513_v12  ;;  %v1799_v56 = vor.u32 %v1798_v9, %v1795_v17  ;;  %1814 = vst [vmem:[%s3267_s13 + $0x18] sm:$0xf] %v1812_v20  ;;  %v1698_v28 = vpop.f32.mrb[38].mxu1  ;;  %v1822_v30 = vshrl.u32 %v2165_v0, 16 }
 0x210   : > { %1515 = vst [vmem:[%s2891_s19 + $0x2c] sm:$0x1] %v1514_v26  ;;  %v1827_v36 = vshrl.u32 %v2167_v53, 16  ;;  %v2466_v31 = vpop.f32.mrb[39].mxu1  ;;  %v1830_v14 = vshll.u32 %v2167_v53, 16 }
 0x211   : > { %v1800_v29 = vsel %vm1782_vm0, %v1791_v24, %v1799_v56  ;;  %v2122_v63 = vrot.slane %v1822_v30, 11 }
 0x212   : > { %1802 = vst [vmem:[%s3267_s13 + $0x14] sm:$0xf] %v1800_v29  ;;  %v1829_v32 = vrot.slane %v1827_v36, 7 }
 0x214   : > { %v1832_v18 = vor.u32 %v1830_v14, %v1829_v32 }
 0x216   : > { %v1833_v33 = vsel %vm3371_vm9, %v2122_v63, %v1832_v18 }
 0x217   : > { %1835 = vst [vmem:[%s3267_s13 + $0x1c] sm:$0xf] %v1833_v33 }
 0x218   : > { %2694 = shalt.err (!%p2691_p7)
}
 0x219   : > { %s2695_s8 = scalar_lea.hbm %s3425_s20, 512  ;;  %s2699_s17 = scalar_lea.hbm %s3480_s7, 1024 }
 0x21a   : > { %p2696_p8 = scmp.ne.s32.totalorder %s3425_s20, %s2695_s8  ;;  %p2700_p1 = scmp.lt.u32.totalorder %s3425_s20, %s3480_s7 }
 0x21b   : > { %p2701_p0 = scmp.lt.u32.totalorder %s2699_s17, %s2695_s8  ;;  %p2703_p6 = scmp.lt.u32.totalorder %s2695_s8, %s3425_s20 }
 0x21c   : > { %p2697_p11 = pnand %p2696_p8, %p3528_p9 }
 0x21d   : > { %p2702_p5 = por %p2701_p0, %p2700_p1 }
 0x21e   : > { %p2698_p13 = pneg %p2697_p11 }
 0x21f   : > { %p2704_p10 = por %p2703_p6, %p2702_p5 }
 0x221   : > { %p2705_p12 = pnand %p2704_p10, %p2698_p13 }
 0x223   : > { %2708 = shalt.err (!%p2705_p12)
}
 0x224   : > { %s2756_s19 = smov 64   ;;  %s2757_s16 = smov 4  }
 0x225   : > { %2538 = dma.vmem_to_hbm [thread:$0]  (%p3528_p9), %s3420_s15, 512, %s3425_s20, %s3432_s21, %s2756_s19, %s2756_s19, %s2757_s16  }
 0x226 PF: > { %p2550_p2 = scmp.ge.s32.totalorder %s2747_s27, 2  ;;  %s1881_s28 = sand.u32 1, %s2735_s24  }
 0x227   : > { %p3529_p3 = scmp.ne.s32.totalorder %s3488_s12, 0  ;;  %s1882_s22 = scalar_lea.sflag [#allocation5], %s1881_s28 }
 0x229   : > { %p2545_p4 = pnand %p2550_p2, %p3529_p3 }
 0x22b   : > { %2730 = dma.done.wait (!%p2545_p4), %s1882_s22, 512  }
 0x22c   : > { %2732 = vsyncadd (!%p2545_p4), %s1882_s22, 4294966784  ;;  %p19_p7 = scmp.ge.s32.totalorder %s2823_s30, 4   ;;  %s3530_s24 = smov %s2739_s25 }
 0x22d   : > { %s3531_s25 = smov %s2743_s26  ;;  %s3532_s26 = smov %s2834_s10 }
 0x22e   : > { %s3533_s27 = smov %s2823_s30  ;;  %21 = sbr.rel (!%p19_p7) target bundleno = 4 (0x4), region = 99 }
 0x235   :  { %1887 = vsyncpa [#allocation4], 1 }
 0x236   :  { %1889 = vsyncpa [#allocation4 + $0x1], 1 }
 0x237   :  { %1890 = vsyncpa [#allocation5], 1 }
 0x238   :  { %1892 = vsyncpa [#allocation5 + $0x1], 1 }

</bundles_post_ra>
